<compile_context>
chip_gen: v7x
topology: tpu7x:2x2x1
jax: 0.10.0
libtpu: 0.0.40
codegen_flags: <defaults>
</compile_context>

<pallas_src>
import functools
import numpy as np
import jax
import jax.numpy as jnp
from jax import lax
from jax.experimental import pallas as pl
from jax.experimental.pallas import tpu as pltpu


_IN_BOX_EPS = 1e-8      # eps used by anchors_in_gt_boxes (its own default)
_TOPK_LANES = 128       # lane-padded width of the running top-k scratch
_BIG_IDX = 2 ** 30


def _cdiv(a, b):
    return -(-a // b)


def _pow(x, p):
    """x**p: square-and-multiply for small integer p, EUP exp/log otherwise."""
    p = float(p)
    if p.is_integer() and 0 <= p <= 64:
        n = int(p)
        if n == 0:
            return jnp.ones_like(x)
        result, base = None, x
        while n:
            if n & 1:
                result = base if result is None else result * base
            n >>= 1
            if n:
                base = base * base
        return result
    safe = jnp.where(x > 0, x, 1.0)
    return jnp.where(x > 0, jnp.exp(p * jnp.log(safe)), 0.0)


def _tile_metrics(ps_ca, pb_4a, ap_2a, gl_m1, gb_m4, gm_m1, *, alpha, beta):
    """Per-tile in-box mask, IoU and alignment metric.

    ps_ca: (C, A') pred scores      pb_4a: (4, A') pred boxes (xyxy)
    ap_2a: (2, A') anchor points    gl_m1: (M, 1) gt labels (int32)
    gb_m4: (M, 4) gt boxes (xyxy)   gm_m1: (M, 1) gt validity (0/1 float)
    Returns mask_in (bool), iou (f32), align (f32), all (M, A').
    """
    f32 = jnp.float32
    ax, ay = ap_2a[0:1, :], ap_2a[1:2, :]
    x1p, y1p, x2p, y2p = pb_4a[0:1, :], pb_4a[1:2, :], pb_4a[2:3, :], pb_4a[3:4, :]
    x1g, y1g, x2g, y2g = gb_m4[:, 0:1], gb_m4[:, 1:2], gb_m4[:, 2:3], gb_m4[:, 3:4]

    # anchors_in_gt_boxes (times gt validity)
    d_min = jnp.minimum(jnp.minimum(ax - x1g, ay - y1g),
                        jnp.minimum(x2g - ax, y2g - ay))
    mask_in = jnp.logical_and(d_min > _IN_BOX_EPS, gm_m1 > 0.5)          # (M, A')

    # IoU (xyxy), masked to in-box positions like the torch reference
    iw = jnp.maximum(jnp.minimum(x2g, x2p) - jnp.maximum(x1g, x1p), 0.0)
    ih = jnp.maximum(jnp.minimum(y2g, y2p) - jnp.maximum(y1g, y1p), 0.0)
    inter = iw * ih
    area_g = (x2g - x1g) * (y2g - y1g)
    area_p = (x2p - x1p) * (y2p - y1p)
    iou = jnp.where(mask_in, inter / (area_g + area_p - inter + 1e-7), 0.0)

    # pred_scores[:, gt_label[m]] gather via one-hot matmul (MXU, idle-rich)
    C = ps_ca.shape[0]
    M = gb_m4.shape[0]
    c_iota = lax.broadcasted_iota(jnp.int32, (M, C), 1)
    onehot_mc = (c_iota == gl_m1).astype(f32)                            # int compare
    cls_ma = jnp.dot(onehot_mc, ps_ca, preferred_element_type=f32)       # (M, A')

    align = jnp.where(mask_in, _pow(cls_ma, alpha) * _pow(iou, beta), 0.0)
    return mask_in, iou, align


def _tal_kernel(ps_ref, pb_ref, ap_ref, gl_ref, gb_ref, gbt_ref, gm_ref,
                lab_ref, box_ref, fg_ref, al_ref, tidx_ref, scale_ref,
                vals_scr, idxs_scr, pos_a_scr, pos_i_scr, *,
                topk, num_classes, alpha, beta, eps, a_tile):
    f32 = jnp.float32
    p = pl.program_id(1)          # 0: top-k accumulation pass, 1: assignment pass
    t = pl.program_id(2)          # A-tile index
    n_t = pl.num_programs(2)

    ps = ps_ref[0]                # (C, At)
    pb = pb_ref[0]                # (4, At)
    ap = ap_ref[...]              # (2, At)
    gl_i = gl_ref[0]              # (M, 1) int32
    gb = gb_ref[0]                # (M, 4)
    gbt = gbt_ref[0]              # (4, M)
    gm = gm_ref[0]                # (M, 1)

    M = gb.shape[0]
    At = ps.shape[1]

    mask_in, iou, align = _tile_metrics(ps, pb, ap, gl_i, gb, gm,
                                        alpha=alpha, beta=beta)
    # global anchor indices of this tile (lane-dense row)
    a_glob = t * a_tile + lax.broadcasted_iota(jnp.int32, (1, At), 1)    # (1, At)

    # ---------------- pass 0: merge tile into per-GT running top-k ----------------
    @pl.when(p == 0)
    def _pass0():
        @pl.when(t == 0)
        def _():
            vals_scr[...] = jnp.full(vals_scr.shape, -jnp.inf, f32)
            idxs_scr[...] = jnp.full(idxs_scr.shape, _BIG_IDX, jnp.int32)

        work_v = jnp.concatenate([vals_scr[...], align], axis=1)         # (M, 128+At)
        work_i = jnp.concatenate(
            [idxs_scr[...], jnp.broadcast_to(a_glob, (M, At))], axis=1)  # (M, 128+At)
        col = lax.broadcasted_iota(jnp.int32, (1, _TOPK_LANES), 1)

        def body(j, carry):
            wv, acc_v, acc_i = carry
            rowmax = jnp.max(wv, axis=1, keepdims=True)                  # (M, 1)
            sel_i = jnp.min(jnp.where(wv == rowmax, work_i, _BIG_IDX),
                            axis=1, keepdims=True)                       # lowest-index tie
            sel = jnp.logical_and(wv == rowmax, work_i == sel_i)         # exact one-hot
            hit = col == j
            return (jnp.where(sel, -jnp.inf, wv),
                    jnp.where(hit, rowmax, acc_v),
                    jnp.where(hit, sel_i, acc_i))

        _, new_v, new_i = lax.fori_loop(
            0, topk, body,
            (work_v,
             jnp.full((M, _TOPK_LANES), -jnp.inf, f32),
             jnp.full((M, _TOPK_LANES), _BIG_IDX, jnp.int32)))
        vals_scr[...] = new_v
        idxs_scr[...] = new_i

    # ---------------- pass 1: final mask, targets, per-GT maxima ----------------
    @pl.when(p == 1)
    def _pass1():
        @pl.when(t == 0)
        def _():
            pos_a_scr[...] = jnp.zeros(pos_a_scr.shape, f32)
            pos_i_scr[...] = jnp.zeros(pos_i_scr.shape, f32)

        vals_all = vals_scr[...]
        idxs_all = idxs_scr[...]
        v_k = vals_all[:, topk - 1:topk]       # (M, 1) value of the k-th candidate
        i_k = idxs_all[:, topk - 1:topk]       # (M, 1) its global anchor index

        # exact torch.topk membership (incl. lowest-index tie-break at the k-th value)
        in_topk = jnp.logical_or(align > v_k,
                                 jnp.logical_and(align == v_k, a_glob <= i_k))
        mask_f = jnp.logical_and(in_topk, mask_in).astype(f32)           # (M, At)

        fg = jnp.sum(mask_f, axis=0, keepdims=True)                      # (1, At)
        m_iota = lax.broadcasted_iota(jnp.int32, (M, 1), 0)

        # select_highest_iou: anchors claimed by >1 GT go to the first argmax-IoU GT
        iou_max = jnp.max(iou, axis=0, keepdims=True)
        best_iou_idx = jnp.min(jnp.where(iou == iou_max, m_iota, M),
                               axis=0, keepdims=True)                    # (1, At)
        best_iou_onehot = (m_iota == best_iou_idx).astype(f32)
        mask_f = jnp.where(fg > 1.0, best_iou_onehot, mask_f)
        fg = jnp.sum(mask_f, axis=0, keepdims=True)

        mask_max = jnp.max(mask_f, axis=0, keepdims=True)
        tgt_idx = jnp.min(jnp.where(mask_f == mask_max, m_iota, M),
                          axis=0, keepdims=True)                         # (1, At)
        onehot_b = m_iota == tgt_idx
        onehot_f = onehot_b.astype(f32)

        labels_f = jnp.sum(onehot_f * gl_i.astype(f32), axis=0, keepdims=True)
        labels = jnp.clip(labels_f, 0.0, float(num_classes)).astype(jnp.int32)
        boxes = jnp.dot(gbt, onehot_f, preferred_element_type=f32)       # (4, At)

        align_m = align * mask_f
        iou_m = iou * mask_f
        pos_a_scr[...] = jnp.maximum(pos_a_scr[...],
                                     jnp.max(align_m, axis=1, keepdims=True))
        pos_i_scr[...] = jnp.maximum(pos_i_scr[...],
                                     jnp.max(iou_m, axis=1, keepdims=True))

        lab_ref[0] = labels
        box_ref[0] = boxes
        fg_ref[0] = fg
        al_ref[0] = jnp.sum(align_m, axis=0, keepdims=True)   # align at assigned GT
        tidx_ref[0] = tgt_idx

        @pl.when(t == n_t - 1)
        def _():
            # per-GT normalization scale (single small divide, per review)
            scale_ref[0] = pos_i_scr[...] / (pos_a_scr[...] + eps)


def _default_vmem_limit_bytes():
    # ~75% of per-core VMEM: ~96 MiB on v5e/v6e (128 MiB phys), ~48 MiB on v7x (64 MiB).
    try:
        cap = int(pltpu.get_tpu_info().vmem_capacity_bytes)
        return max(32 * 1024 * 1024, min((cap * 3) // 4, 112 * 1024 * 1024))
    except Exception:
        return 48 * 1024 * 1024


def task_aligned_assigner(pred_scores, pred_boxes, anchor_points,
                          gt_labels, gt_boxes, gt_mask, *,
                          topk=10, num_classes=80, alpha=1.0, beta=6.0, eps=1e-8,
                          a_tile=1024, transposed_inputs=False,
                          transposed_outputs=False, dense_scores=True):
    """Returns (target_labels, target_boxes, target_scores, fg_mask).

    If dense_scores=False the third output is the per-anchor score factor
    (B, A); dense scores == one_hot(labels, num_classes) * factor[..., None].
    """
    f32 = jnp.float32
    if transposed_inputs:
        B, C, A = pred_scores.shape
    else:
        B, A, C = pred_scores.shape
    M = gt_boxes.shape[1]

    if M == 0:   # matches the torch early-exit (bg labels, zero boxes/scores)
        labels = jnp.full((B, A), num_classes, jnp.int32)
        fg = jnp.zeros((B, A), bool)
        boxes = jnp.zeros((B, 4, A) if transposed_outputs else (B, A, 4), f32)
        if dense_scores:
            scores = jnp.zeros((B, num_classes, A) if transposed_outputs
                               else (B, A, num_classes), f32)
        else:
            scores = jnp.zeros((B, A), f32)
        return labels, boxes, scores, fg

    assert 1 <= topk <= min(A, _TOPK_LANES), "topk must be in [1, min(A, 128)]"

    a_round = _cdiv(A, 128) * 128
    a_tile = max(128, min((int(a_tile) // 128) * 128, a_round))
    n_tiles = _cdiv(A, a_tile)
    A_pad = n_tiles * a_tile
    M_pad = max(8, _cdiv(M, 8) * 8)

    # layout plumbing (skipped entirely when transposed_inputs=True)
    if transposed_inputs:
        ps_t = pred_scores.astype(f32)                                   # (B, C, A)
        pb_t = pred_boxes.astype(f32)                                    # (B, 4, A)
        ap_t = anchor_points.astype(f32)                                 # (2, A)
    else:
        ps_t = jnp.transpose(pred_scores, (0, 2, 1)).astype(f32)
        pb_t = jnp.transpose(pred_boxes, (0, 2, 1)).astype(f32)
        ap_t = jnp.transpose(anchor_points).astype(f32)
    gl = gt_labels.reshape(B, M, 1).astype(jnp.int32)
    gb = gt_boxes.astype(f32)
    gm = gt_mask.reshape(B, M, 1).astype(f32)

    if A_pad != A:
        pa = A_pad - A
        ps_t = jnp.pad(ps_t, ((0, 0), (0, 0), (0, pa)))
        pb_t = jnp.pad(pb_t, ((0, 0), (0, 0), (0, pa)))
        # padded anchor centers live far outside any GT box -> never positive
        ap_t = jnp.pad(ap_t, ((0, 0), (0, pa)), constant_values=-1e6)
    if M_pad != M:
        pm = M_pad - M
        gl = jnp.pad(gl, ((0, 0), (0, pm), (0, 0)))
        gb = jnp.pad(gb, ((0, 0), (0, pm), (0, 0)))
        gm = jnp.pad(gm, ((0, 0), (0, pm), (0, 0)))
    gb_t = jnp.transpose(gb, (0, 2, 1))                                  # (B, 4, M_pad)

    kernel = functools.partial(_tal_kernel, topk=topk, num_classes=num_classes,
                               alpha=alpha, beta=beta, eps=eps, a_tile=a_tile)

    lab, boxes_t, fg_cnt, asg_align, tgt_idx, scale = pl.pallas_call(
        kernel,
        out_shape=(
            jax.ShapeDtypeStruct((B, 1, A_pad), jnp.int32),      # labels
            jax.ShapeDtypeStruct((B, 4, A_pad), f32),            # boxes (lane-dense)
            jax.ShapeDtypeStruct((B, 1, A_pad), f32),            # fg count
            jax.ShapeDtypeStruct((B, 1, A_pad), f32),            # assigned align
            jax.ShapeDtypeStruct((B, 1, A_pad), jnp.int32),      # assigned gt idx
            jax.ShapeDtypeStruct((B, M_pad, 1), f32),            # per-gt scale
        ),
        grid=(B, 2, n_tiles),
        in_specs=[
            pl.BlockSpec((1, C, a_tile), lambda b, p, t: (b, 0, t)),
            pl.BlockSpec((1, 4, a_tile), lambda b, p, t: (b, 0, t)),
            pl.BlockSpec((2, a_tile), lambda b, p, t: (0, t)),
            pl.BlockSpec((1, M_pad, 1), lambda b, p, t: (b, 0, 0)),
            pl.BlockSpec((1, M_pad, 4), lambda b, p, t: (b, 0, 0)),
            pl.BlockSpec((1, 4, M_pad), lambda b, p, t: (b, 0, 0)),
            pl.BlockSpec((1, M_pad, 1), lambda b, p, t: (b, 0, 0)),
        ],
        out_specs=(
            # park on block 0 during pass 0 so no unwritten tile is ever flushed
            pl.BlockSpec((1, 1, a_tile), lambda b, p, t: (b, 0, p * t)),
            pl.BlockSpec((1, 4, a_tile), lambda b, p, t: (b, 0, p * t)),
            pl.BlockSpec((1, 1, a_tile), lambda b, p, t: (b, 0, p * t)),
            pl.BlockSpec((1, 1, a_tile), lambda b, p, t: (b, 0, p * t)),
            pl.BlockSpec((1, 1, a_tile), lambda b, p, t: (b, 0, p * t)),
            pl.BlockSpec((1, M_pad, 1), lambda b, p, t: (b, 0, 0)),
        ),
        scratch_shapes=[
            pltpu.VMEM((M_pad, _TOPK_LANES), jnp.float32),   # running top-k values
            pltpu.VMEM((M_pad, _TOPK_LANES), jnp.int32),     # running top-k anchor ids
            pltpu.VMEM((M_pad, 1), jnp.float32),             # pos_align accumulator
            pltpu.VMEM((M_pad, 1), jnp.float32),             # pos_iou accumulator
        ],
        compiler_params=pltpu.CompilerParams(
            dimension_semantics=("parallel", "arbitrary", "arbitrary"),
            vmem_limit_bytes=_default_vmem_limit_bytes()),
    )(ps_t, pb_t, ap_t, gl, gb, gb_t, gm)

    labels = lab[:, 0, :A]
    fg_f = fg_cnt[:, 0, :A]
    fg_mask = fg_f > 0.0
    asg_align = asg_align[:, 0, :A]
    tgt_idx = tgt_idx[:, 0, :A]
    scale = scale[:, :, 0]                                               # (B, M_pad)

    # per-anchor align_metrics_norm: align at assigned GT * that GT's scale
    factor = asg_align * jnp.take_along_axis(scale, tgt_idx, axis=1)
    factor = jnp.where(fg_mask, factor, 0.0)

    boxes_t = boxes_t[:, :, :A]
    target_boxes = boxes_t if transposed_outputs else jnp.transpose(boxes_t, (0, 2, 1))

    if not dense_scores:
        return labels, target_boxes, factor, fg_mask

    if transposed_outputs:
        cls_ids = jnp.arange(num_classes, dtype=jnp.int32)[None, :, None]
        scores = (labels[:, None, :] == cls_ids).astype(f32) * factor[:, None, :]
    else:
        scores = jax.nn.one_hot(labels, num_classes, dtype=f32) * factor[..., None]
    return labels, target_boxes, scores, fg_mask


def _reference(pred_scores, pred_boxes, anchor_points, gt_labels, gt_boxes, gt_mask, *,
               topk, num_classes, alpha, beta, eps):
    """Monolithic pure-JAX reference of the torch forward (validates the tiled kernel)."""
    f32 = jnp.float32
    ps = jnp.transpose(pred_scores, (0, 2, 1)).astype(f32)
    pb = jnp.transpose(pred_boxes, (0, 2, 1)).astype(f32)
    ap = jnp.transpose(anchor_points).astype(f32)
    gl = gt_labels.astype(jnp.int32)
    gb = gt_boxes.astype(f32)
    gm = gt_mask.astype(f32)
    A = ps.shape[2]
    M = gb.shape[1]

    def one(ps_b, pb_b, gl_b, gb_b, gm_b):
        mask_in, iou, align = _tile_metrics(ps_b, pb_b, ap, gl_b, gb_b, gm_b,
                                            alpha=alpha, beta=beta)
        a_iota = lax.broadcasted_iota(jnp.int32, (1, A), 1)

        def body(_, carry):
            work, sel_mask = carry
            rowmax = jnp.max(work, axis=1, keepdims=True)
            sel_idx = jnp.min(jnp.where(work == rowmax, a_iota, A),
                              axis=1, keepdims=True)
            sel = a_iota == sel_idx
            return jnp.where(sel, -jnp.inf, work), jnp.logical_or(sel_mask, sel)

        _, topk_b = lax.fori_loop(0, topk, body, (align, jnp.zeros((M, A), bool)))
        mask = jnp.logical_and(topk_b, mask_in).astype(f32)

        fg = jnp.sum(mask, axis=0)
        m_iota = lax.broadcasted_iota(jnp.int32, (M, 1), 0)
        best_iou_onehot = (m_iota == jnp.argmax(iou, axis=0)[None, :]).astype(f32)
        mask = jnp.where(fg[None, :] > 1.0, best_iou_onehot, mask)
        fg = jnp.sum(mask, axis=0)
        tgt = jnp.argmax(mask, axis=0)

        labels = jnp.clip(gl_b[:, 0][tgt], 0, num_classes).astype(jnp.int32)
        boxes = gb_b[tgt]

        align_m = align * mask
        pos_align = jnp.max(align_m, axis=1, keepdims=True)
        pos_iou = jnp.max(iou * mask, axis=1, keepdims=True)
        norm = jnp.max(align_m * pos_iou / (pos_align + eps), axis=0)

        scores = (jax.nn.one_hot(labels, num_classes, dtype=f32)
                  * (fg > 0)[:, None].astype(f32) * norm[:, None])
        return labels, boxes, scores, fg > 0

    return jax.vmap(one)(ps, pb, gl, gb, gm)


if __name__ == "__main__":
    B, C, M, TOPK = 2, 16, 7, 10
    GW, GH = 24, 16
    A = GW * GH                      # 384 anchors -> 3 A-tiles of 128 in this test

    key = jax.random.PRNGKey(0)
    k1, k2, k3, k4, k5, k6 = jax.random.split(key, 6)

    xs = jnp.arange(GW, dtype=jnp.float32) + 0.5
    ys = jnp.arange(GH, dtype=jnp.float32) + 0.5
    gx, gy = jnp.meshgrid(xs, ys)
    anchor_points = jnp.stack([gx.reshape(-1), gy.reshape(-1)], axis=-1)   # (A, 2)

    pred_scores = jax.random.uniform(k1, (B, A, C), jnp.float32)           # (B, A, C)
    pwh = jax.random.uniform(k2, (B, A, 2), jnp.float32, 1.0, 5.0)
    centers = anchor_points[None, :, :]
    pred_boxes = jnp.concatenate([centers - pwh / 2, centers + pwh / 2], -1)

    gt_cxy = jnp.concatenate(
        [jax.random.uniform(k3, (B, M, 1), jnp.float32, 4.0, GW - 4.0),
         jax.random.uniform(k4, (B, M, 1), jnp.float32, 4.0, GH - 4.0)], axis=-1)
    gt_wh = jax.random.uniform(k5, (B, M, 2), jnp.float32, 2.0, 6.0)
    gt_boxes = jnp.concatenate([gt_cxy - gt_wh / 2, gt_cxy + gt_wh / 2], -1)
    gt_labels = jax.random.randint(k6, (B, M, 1), 0, C).astype(jnp.int32)
    n_valid = jnp.array([5, 3])
    gt_mask = (jnp.arange(M)[None, :, None] < n_valid[:, None, None]).astype(jnp.float32)

    kw = dict(topk=TOPK, num_classes=C, alpha=1.0, beta=6.0, eps=1e-8)
    out = task_aligned_assigner(pred_scores, pred_boxes, anchor_points,
                                gt_labels, gt_boxes, gt_mask,
                                a_tile=128, **kw)      # force the multi-tile path
    out = jax.block_until_ready(out)
    t_labels, t_boxes, t_scores, t_fg = out

    r_labels, r_boxes, r_scores, r_fg = _reference(
        pred_scores, pred_boxes, anchor_points, gt_labels, gt_boxes, gt_mask, **kw)

    np.testing.assert_array_equal(np.asarray(t_labels), np.asarray(r_labels))
    np.testing.assert_array_equal(np.asarray(t_fg), np.asarray(r_fg))
    np.testing.assert_allclose(np.asarray(t_boxes), np.asarray(r_boxes),
                               rtol=1e-5, atol=1e-6)
    np.testing.assert_allclose(np.asarray(t_scores), np.asarray(r_scores),
                               rtol=1e-4, atol=1e-6)

    print("KERNEL_OK")
</pallas_src>

<mosaic_0001>
module attributes {stable_mosaic.version = 11 : i64} {
  func.func @_tal_kernel(%arg0: i32, %arg1: i32, %arg2: i32, %arg3: memref<1x16x128xf32, #tpu.memory_space<vmem>>, %arg4: memref<1x4x128xf32, #tpu.memory_space<vmem>>, %arg5: memref<2x128xf32, #tpu.memory_space<vmem>>, %arg6: memref<1x8x1xi32, #tpu.memory_space<vmem>>, %arg7: memref<1x8x4xf32, #tpu.memory_space<vmem>>, %arg8: memref<1x4x8xf32, #tpu.memory_space<vmem>>, %arg9: memref<1x8x1xf32, #tpu.memory_space<vmem>>, %arg10: memref<1x1x128xi32, #tpu.memory_space<vmem>>, %arg11: memref<1x4x128xf32, #tpu.memory_space<vmem>>, %arg12: memref<1x1x128xf32, #tpu.memory_space<vmem>>, %arg13: memref<1x1x128xf32, #tpu.memory_space<vmem>>, %arg14: memref<1x1x128xi32, #tpu.memory_space<vmem>>, %arg15: memref<1x8x1xf32, #tpu.memory_space<vmem>>, %arg16: memref<8x128xf32, #tpu.memory_space<vmem>>, %arg17: memref<8x128xi32, #tpu.memory_space<vmem>>, %arg18: memref<8x1xf32, #tpu.memory_space<vmem>>, %arg19: memref<8x1xf32, #tpu.memory_space<vmem>>) attributes {dimension_semantics = [#tpu.dimension_semantics<parallel>, #tpu.dimension_semantics<arbitrary>, #tpu.dimension_semantics<arbitrary>], iteration_bounds = array<i64: 2, 2, 3>, scalar_prefetch = 0 : i64, scratch_operands = 4 : i64, tpu.core_type = #tpu.core_type<tc>, window_params = [{transform_indices = @transform_0, window_bounds = array<i64: 1, 16, 128>}, {transform_indices = @transform_1, window_bounds = array<i64: 1, 4, 128>}, {transform_indices = @transform_2, window_bounds = array<i64: 2, 128>}, {transform_indices = @transform_3, window_bounds = array<i64: 1, 8, 1>}, {transform_indices = @transform_4, window_bounds = array<i64: 1, 8, 4>}, {transform_indices = @transform_5, window_bounds = array<i64: 1, 4, 8>}, {transform_indices = @transform_6, window_bounds = array<i64: 1, 8, 1>}, {transform_indices = @transform_7, window_bounds = array<i64: 1, 1, 128>}, {transform_indices = @transform_8, window_bounds = array<i64: 1, 4, 128>}, {transform_indices = @transform_9, window_bounds = array<i64: 1, 1, 128>}, {transform_indices = @transform_10, window_bounds = array<i64: 1, 1, 128>}, {transform_indices = @transform_11, window_bounds = array<i64: 1, 1, 128>}, {transform_indices = @transform_12, window_bounds = array<i64: 1, 8, 1>}]} {
    %c0 = arith.constant 0 : index
    %c0_0 = arith.constant 0 : index
    %c0_1 = arith.constant 0 : index
    %0 = vector.load %arg3[%c0, %c0_0, %c0_1] : memref<1x16x128xf32, #tpu.memory_space<vmem>>, vector<1x16x128xf32>
    %1 = vector.shape_cast %0 : vector<1x16x128xf32> to vector<16x128xf32>
    %c0_2 = arith.constant 0 : index
    %c0_3 = arith.constant 0 : index
    %c0_4 = arith.constant 0 : index
    %2 = vector.load %arg4[%c0_2, %c0_3, %c0_4] : memref<1x4x128xf32, #tpu.memory_space<vmem>>, vector<1x4x128xf32>
    %3 = vector.shape_cast %2 : vector<1x4x128xf32> to vector<4x128xf32>
    %c0_5 = arith.constant 0 : index
    %c0_6 = arith.constant 0 : index
    %4 = vector.load %arg5[%c0_5, %c0_6] : memref<2x128xf32, #tpu.memory_space<vmem>>, vector<2x128xf32>
    %c0_7 = arith.constant 0 : index
    %c0_8 = arith.constant 0 : index
    %c0_9 = arith.constant 0 : index
    %5 = vector.load %arg6[%c0_7, %c0_8, %c0_9] : memref<1x8x1xi32, #tpu.memory_space<vmem>>, vector<1x8x1xi32>
    %6 = vector.shape_cast %5 : vector<1x8x1xi32> to vector<8x1xi32>
    %c0_10 = arith.constant 0 : index
    %c0_11 = arith.constant 0 : index
    %c0_12 = arith.constant 0 : index
    %7 = vector.load %arg7[%c0_10, %c0_11, %c0_12] : memref<1x8x4xf32, #tpu.memory_space<vmem>>, vector<1x8x4xf32>
    %8 = vector.shape_cast %7 : vector<1x8x4xf32> to vector<8x4xf32>
    %c0_13 = arith.constant 0 : index
    %c0_14 = arith.constant 0 : index
    %c0_15 = arith.constant 0 : index
    %9 = vector.load %arg8[%c0_13, %c0_14, %c0_15] : memref<1x4x8xf32, #tpu.memory_space<vmem>>, vector<1x4x8xf32>
    %10 = vector.shape_cast %9 : vector<1x4x8xf32> to vector<4x8xf32>
    %c0_16 = arith.constant 0 : index
    %c0_17 = arith.constant 0 : index
    %c0_18 = arith.constant 0 : index
    %11 = vector.load %arg9[%c0_16, %c0_17, %c0_18] : memref<1x8x1xf32, #tpu.memory_space<vmem>>, vector<1x8x1xf32>
    %12 = vector.shape_cast %11 : vector<1x8x1xf32> to vector<8x1xf32>
    %13 = vector.extract_strided_slice %4 {offsets = [0, 0], sizes = [1, 128], strides = [1, 1]} : vector<2x128xf32> to vector<1x128xf32>
    %14 = vector.extract_strided_slice %4 {offsets = [1, 0], sizes = [1, 128], strides = [1, 1]} : vector<2x128xf32> to vector<1x128xf32>
    %15 = vector.extract_strided_slice %3 {offsets = [0, 0], sizes = [1, 128], strides = [1, 1]} : vector<4x128xf32> to vector<1x128xf32>
    %16 = vector.extract_strided_slice %3 {offsets = [1, 0], sizes = [1, 128], strides = [1, 1]} : vector<4x128xf32> to vector<1x128xf32>
    %17 = vector.extract_strided_slice %3 {offsets = [2, 0], sizes = [1, 128], strides = [1, 1]} : vector<4x128xf32> to vector<1x128xf32>
    %18 = vector.extract_strided_slice %3 {offsets = [3, 0], sizes = [1, 128], strides = [1, 1]} : vector<4x128xf32> to vector<1x128xf32>
    %19 = vector.extract_strided_slice %8 {offsets = [0, 0], sizes = [8, 1], strides = [1, 1]} : vector<8x4xf32> to vector<8x1xf32>
    %20 = vector.extract_strided_slice %8 {offsets = [0, 1], sizes = [8, 1], strides = [1, 1]} : vector<8x4xf32> to vector<8x1xf32>
    %21 = vector.extract_strided_slice %8 {offsets = [0, 2], sizes = [8, 1], strides = [1, 1]} : vector<8x4xf32> to vector<8x1xf32>
    %22 = vector.extract_strided_slice %8 {offsets = [0, 3], sizes = [8, 1], strides = [1, 1]} : vector<8x4xf32> to vector<8x1xf32>
    %23 = vector.broadcast %13 : vector<1x128xf32> to vector<8x128xf32>
    %24 = vector.broadcast %19 : vector<8x1xf32> to vector<8x128xf32>
    %25 = arith.subf %23, %24 : vector<8x128xf32>
    %26 = vector.broadcast %14 : vector<1x128xf32> to vector<8x128xf32>
    %27 = vector.broadcast %20 : vector<8x1xf32> to vector<8x128xf32>
    %28 = arith.subf %26, %27 : vector<8x128xf32>
    %29 = arith.minimumf %25, %28 : vector<8x128xf32>
    %30 = vector.broadcast %21 : vector<8x1xf32> to vector<8x128xf32>
    %31 = vector.broadcast %13 : vector<1x128xf32> to vector<8x128xf32>
    %32 = arith.subf %30, %31 : vector<8x128xf32>
    %33 = vector.broadcast %22 : vector<8x1xf32> to vector<8x128xf32>
    %34 = vector.broadcast %14 : vector<1x128xf32> to vector<8x128xf32>
    %35 = arith.subf %33, %34 : vector<8x128xf32>
    %36 = arith.minimumf %32, %35 : vector<8x128xf32>
    %37 = arith.minimumf %29, %36 : vector<8x128xf32>
    %cst = arith.constant 9.99999993E-9 : f32
    %38 = vector.broadcast %cst : f32 to vector<8x128xf32>
    %39 = arith.cmpf ogt, %37, %38 : vector<8x128xf32>
    %cst_19 = arith.constant 5.000000e-01 : f32
    %40 = vector.broadcast %cst_19 : f32 to vector<8x1xf32>
    %41 = arith.cmpf ogt, %12, %40 : vector<8x1xf32>
    %42 = vector.broadcast %41 : vector<8x1xi1> to vector<8x128xi1>
    %43 = arith.andi %39, %42 : vector<8x128xi1>
    %44 = vector.broadcast %21 : vector<8x1xf32> to vector<8x128xf32>
    %45 = vector.broadcast %17 : vector<1x128xf32> to vector<8x128xf32>
    %46 = arith.minimumf %44, %45 : vector<8x128xf32>
    %47 = vector.broadcast %19 : vector<8x1xf32> to vector<8x128xf32>
    %48 = vector.broadcast %15 : vector<1x128xf32> to vector<8x128xf32>
    %49 = arith.maximumf %47, %48 : vector<8x128xf32>
    %50 = arith.subf %46, %49 : vector<8x128xf32>
    %cst_20 = arith.constant 0.000000e+00 : f32
    %51 = vector.broadcast %cst_20 : f32 to vector<8x128xf32>
    %52 = arith.maximumf %50, %51 : vector<8x128xf32>
    %53 = vector.broadcast %22 : vector<8x1xf32> to vector<8x128xf32>
    %54 = vector.broadcast %18 : vector<1x128xf32> to vector<8x128xf32>
    %55 = arith.minimumf %53, %54 : vector<8x128xf32>
    %56 = vector.broadcast %20 : vector<8x1xf32> to vector<8x128xf32>
    %57 = vector.broadcast %16 : vector<1x128xf32> to vector<8x128xf32>
    %58 = arith.maximumf %56, %57 : vector<8x128xf32>
    %59 = arith.subf %55, %58 : vector<8x128xf32>
    %cst_21 = arith.constant 0.000000e+00 : f32
    %60 = vector.broadcast %cst_21 : f32 to vector<8x128xf32>
    %61 = arith.maximumf %59, %60 : vector<8x128xf32>
    %62 = arith.mulf %52, %61 : vector<8x128xf32>
    %63 = arith.subf %21, %19 : vector<8x1xf32>
    %64 = arith.subf %22, %20 : vector<8x1xf32>
    %65 = arith.mulf %63, %64 : vector<8x1xf32>
    %66 = arith.subf %17, %15 : vector<1x128xf32>
    %67 = arith.subf %18, %16 : vector<1x128xf32>
    %68 = arith.mulf %66, %67 : vector<1x128xf32>
    %69 = vector.broadcast %65 : vector<8x1xf32> to vector<8x128xf32>
    %70 = vector.broadcast %68 : vector<1x128xf32> to vector<8x128xf32>
    %71 = arith.addf %69, %70 : vector<8x128xf32>
    %72 = arith.subf %71, %62 : vector<8x128xf32>
    %cst_22 = arith.constant 1.000000e-07 : f32
    %73 = vector.broadcast %cst_22 : f32 to vector<8x128xf32>
    %74 = arith.addf %72, %73 : vector<8x128xf32>
    %75 = arith.divf %62, %74 : vector<8x128xf32>
    %cst_23 = arith.constant 0.000000e+00 : f32
    %76 = vector.broadcast %cst_23 : f32 to vector<8x128xf32>
    %77 = arith.select %43, %75, %76 : vector<8x128xi1>, vector<8x128xf32>
    %78 = tpu.iota {dimensions = array<i32: 1>} : vector<8x16xi32>
    %79 = vector.broadcast %6 : vector<8x1xi32> to vector<8x16xi32>
    %80 = arith.cmpi eq, %78, %79 : vector<8x16xi32>
    %81 = arith.extui %80 : vector<8x16xi1> to vector<8x16xi32>
    %82 = arith.sitofp %81 : vector<8x16xi32> to vector<8x16xf32>
    %cst_24 = arith.constant dense<0.000000e+00> : vector<8x128xf32>
    %83 = tpu.matmul %82, %1, %cst_24 {dimension_numbers = #tpu.dot_dimension_numbers<[1], [0], [0], [1], [0, 0, 1, 1], [], []>} : vector<8x16xf32>, vector<16x128xf32>, vector<8x128xf32> -> vector<8x128xf32>
    %84 = arith.mulf %77, %77 : vector<8x128xf32>
    %85 = arith.mulf %84, %84 : vector<8x128xf32>
    %86 = arith.mulf %84, %85 : vector<8x128xf32>
    %87 = arith.mulf %83, %86 : vector<8x128xf32>
    %cst_25 = arith.constant 0.000000e+00 : f32
    %88 = vector.broadcast %cst_25 : f32 to vector<8x128xf32>
    %89 = arith.select %43, %87, %88 : vector<8x128xi1>, vector<8x128xf32>
    %c128_i32 = arith.constant 128 : i32
    %90 = arith.muli %arg2, %c128_i32 : i32
    %91 = tpu.iota {dimensions = array<i32: 1>} : vector<1x128xi32>
    %92 = vector.broadcast %90 : i32 to vector<1x128xi32>
    %93 = arith.addi %92, %91 : vector<1x128xi32>
    %c0_i32 = arith.constant 0 : i32
    %94 = arith.cmpi eq, %arg1, %c0_i32 : i32
    %95 = arith.extui %94 : i1 to i32
    %c0_i32_26 = arith.constant 0 : i32
    %96 = arith.cmpi ne, %95, %c0_i32_26 : i32
    scf.if %96 {
      %c0_i32_28 = arith.constant 0 : i32
      %100 = arith.cmpi eq, %arg2, %c0_i32_28 : i32
      %101 = arith.extui %100 : i1 to i32
      %c0_i32_29 = arith.constant 0 : i32
      %102 = arith.cmpi ne, %101, %c0_i32_29 : i32
      scf.if %102 {
        %cst_42 = arith.constant 0xFF800000 : f32
        %116 = vector.broadcast %cst_42 : f32 to vector<8x128xf32>
        %c0_43 = arith.constant 0 : index
        %c0_44 = arith.constant 0 : index
        %117 = vector.load %arg16[%c0_43, %c0_44] : memref<8x128xf32, #tpu.memory_space<vmem>>, vector<8x128xf32>
        tpu.vector_store %arg16[%c0_43, %c0_44], %116 {strides = array<i32>} : memref<8x128xf32, #tpu.memory_space<vmem>>, vector<8x128xf32>,
        %c1073741824_i32_45 = arith.constant 1073741824 : i32
        %118 = vector.broadcast %c1073741824_i32_45 : i32 to vector<8x128xi32>
        %c0_46 = arith.constant 0 : index
        %c0_47 = arith.constant 0 : index
        %119 = vector.load %arg17[%c0_46, %c0_47] : memref<8x128xi32, #tpu.memory_space<vmem>>, vector<8x128xi32>
        tpu.vector_store %arg17[%c0_46, %c0_47], %118 {strides = array<i32>} : memref<8x128xi32, #tpu.memory_space<vmem>>, vector<8x128xi32>,
      } else {
      }
      %c0_30 = arith.constant 0 : index
      %c0_31 = arith.constant 0 : index
      %103 = vector.load %arg16[%c0_30, %c0_31] : memref<8x128xf32, #tpu.memory_space<vmem>>, vector<8x128xf32>
      %104 = tpu.concatenate %103, %89 in 1 : vector<8x128xf32>, vector<8x128xf32> -> vector<8x256xf32>
      %c0_32 = arith.constant 0 : index
      %c0_33 = arith.constant 0 : index
      %105 = vector.load %arg17[%c0_32, %c0_33] : memref<8x128xi32, #tpu.memory_space<vmem>>, vector<8x128xi32>
      %106 = vector.shape_cast %93 : vector<1x128xi32> to vector<1x128xi32>
      %107 = vector.broadcast %106 : vector<1x128xi32> to vector<8x128xi32>
      %108 = tpu.concatenate %105, %107 in 1 : vector<8x128xi32>, vector<8x128xi32> -> vector<8x256xi32>
      %109 = tpu.iota {dimensions = array<i32: 1>} : vector<1x128xi32>
      %cst_34 = arith.constant 0xFF800000 : f32
      %110 = vector.broadcast %cst_34 : f32 to vector<8x128xf32>
      %c1073741824_i32 = arith.constant 1073741824 : i32
      %111 = vector.broadcast %c1073741824_i32 : i32 to vector<8x128xi32>
      %c0_i32_35 = arith.constant 0 : i32
      %c10_i32 = arith.constant 10 : i32
      %112 = arith.addi %c0_i32_35, %c10_i32 : i32
      %c1_i32_36 = arith.constant 1 : i32
      %113:3 = scf.for %arg20 = %c0_i32_35 to %112 step %c1_i32_36 iter_args(%arg21 = %104, %arg22 = %110, %arg23 = %111) -> (vector<8x256xf32>, vector<8x128xf32>, vector<8x128xi32>)  : i32 {
        %cst_42 = arith.constant dense<0xFF800000> : vector<8xf32>
        %116 = vector.multi_reduction <maximumf>, %arg21, %cst_42 [1] : vector<8x256xf32> to vector<8xf32>
        %117 = vector.shape_cast %116 : vector<8xf32> to vector<8x1xf32>
        %118 = vector.broadcast %117 : vector<8x1xf32> to vector<8x256xf32>
        %119 = arith.cmpf oeq, %arg21, %118 : vector<8x256xf32>
        %c1073741824_i32_43 = arith.constant 1073741824 : i32
        %120 = vector.broadcast %c1073741824_i32_43 : i32 to vector<8x256xi32>
        %121 = arith.select %119, %108, %120 : vector<8x256xi1>, vector<8x256xi32>
        %cst_44 = arith.constant dense<2147483647> : vector<8xi32>
        %122 = vector.multi_reduction <minsi>, %121, %cst_44 [1] : vector<8x256xi32> to vector<8xi32>
        %123 = vector.shape_cast %122 : vector<8xi32> to vector<8x1xi32>
        %124 = vector.broadcast %117 : vector<8x1xf32> to vector<8x256xf32>
        %125 = arith.cmpf oeq, %arg21, %124 : vector<8x256xf32>
        %126 = vector.broadcast %123 : vector<8x1xi32> to vector<8x256xi32>
        %127 = arith.cmpi eq, %108, %126 : vector<8x256xi32>
        %128 = arith.andi %125, %127 : vector<8x256xi1>
        %129 = vector.broadcast %arg20 : i32 to vector<1x128xi32>
        %130 = arith.cmpi eq, %109, %129 : vector<1x128xi32>
        %cst_45 = arith.constant 0xFF800000 : f32
        %131 = vector.broadcast %cst_45 : f32 to vector<8x256xf32>
        %132 = arith.select %128, %131, %arg21 : vector<8x256xi1>, vector<8x256xf32>
        %133 = vector.shape_cast %130 : vector<1x128xi1> to vector<1x128xi1>
        %134 = vector.broadcast %133 : vector<1x128xi1> to vector<8x128xi1>
        %135 = vector.shape_cast %117 : vector<8x1xf32> to vector<8x1xf32>
        %136 = vector.broadcast %135 : vector<8x1xf32> to vector<8x128xf32>
        %137 = arith.select %134, %136, %arg22 : vector<8x128xi1>, vector<8x128xf32>
        %138 = vector.shape_cast %130 : vector<1x128xi1> to vector<1x128xi1>
        %139 = vector.broadcast %138 : vector<1x128xi1> to vector<8x128xi1>
        %140 = vector.shape_cast %123 : vector<8x1xi32> to vector<8x1xi32>
        %141 = vector.broadcast %140 : vector<8x1xi32> to vector<8x128xi32>
        %142 = arith.select %139, %141, %arg23 : vector<8x128xi1>, vector<8x128xi32>
        scf.yield %132, %137, %142 : vector<8x256xf32>, vector<8x128xf32>, vector<8x128xi32>
      }
      %c10_i32_37 = arith.constant 10 : i32
      %c0_38 = arith.constant 0 : index
      %c0_39 = arith.constant 0 : index
      %114 = vector.load %arg16[%c0_38, %c0_39] : memref<8x128xf32, #tpu.memory_space<vmem>>, vector<8x128xf32>
      tpu.vector_store %arg16[%c0_38, %c0_39], %113#1 {strides = array<i32>} : memref<8x128xf32, #tpu.memory_space<vmem>>, vector<8x128xf32>,
      %c0_40 = arith.constant 0 : index
      %c0_41 = arith.constant 0 : index
      %115 = vector.load %arg17[%c0_40, %c0_41] : memref<8x128xi32, #tpu.memory_space<vmem>>, vector<8x128xi32>
      tpu.vector_store %arg17[%c0_40, %c0_41], %113#2 {strides = array<i32>} : memref<8x128xi32, #tpu.memory_space<vmem>>, vector<8x128xi32>,
    } else {
    }
    %c1_i32 = arith.constant 1 : i32
    %97 = arith.cmpi eq, %arg1, %c1_i32 : i32
    %98 = arith.extui %97 : i1 to i32
    %c0_i32_27 = arith.constant 0 : i32
    %99 = arith.cmpi ne, %98, %c0_i32_27 : i32
    scf.if %99 {
      %c0_i32_28 = arith.constant 0 : i32
      %100 = arith.cmpi eq, %arg2, %c0_i32_28 : i32
      %101 = arith.extui %100 : i1 to i32
      %c0_i32_29 = arith.constant 0 : i32
      %102 = arith.cmpi ne, %101, %c0_i32_29 : i32
      scf.if %102 {
        %cst_73 = arith.constant 0.000000e+00 : f32
        %202 = vector.broadcast %cst_73 : f32 to vector<8x1xf32>
        %c0_74 = arith.constant 0 : index
        %c0_75 = arith.constant 0 : index
        %203 = vector.load %arg18[%c0_74, %c0_75] : memref<8x1xf32, #tpu.memory_space<vmem>>, vector<8x1xf32>
        tpu.vector_store %arg18[%c0_74, %c0_75], %202 {strides = array<i32>} : memref<8x1xf32, #tpu.memory_space<vmem>>, vector<8x1xf32>,
        %cst_76 = arith.constant 0.000000e+00 : f32
        %204 = vector.broadcast %cst_76 : f32 to vector<8x1xf32>
        %c0_77 = arith.constant 0 : index
        %c0_78 = arith.constant 0 : index
        %205 = vector.load %arg19[%c0_77, %c0_78] : memref<8x1xf32, #tpu.memory_space<vmem>>, vector<8x1xf32>
        tpu.vector_store %arg19[%c0_77, %c0_78], %204 {strides = array<i32>} : memref<8x1xf32, #tpu.memory_space<vmem>>, vector<8x1xf32>,
      } else {
      }
      %c0_30 = arith.constant 0 : index
      %c0_31 = arith.constant 0 : index
      %103 = vector.load %arg16[%c0_30, %c0_31] : memref<8x128xf32, #tpu.memory_space<vmem>>, vector<8x128xf32>
      %c0_32 = arith.constant 0 : index
      %c0_33 = arith.constant 0 : index
      %104 = vector.load %arg17[%c0_32, %c0_33] : memref<8x128xi32, #tpu.memory_space<vmem>>, vector<8x128xi32>
      %105 = vector.extract_strided_slice %103 {offsets = [0, 9], sizes = [8, 1], strides = [1, 1]} : vector<8x128xf32> to vector<8x1xf32>
      %106 = vector.extract_strided_slice %104 {offsets = [0, 9], sizes = [8, 1], strides = [1, 1]} : vector<8x128xi32> to vector<8x1xi32>
      %107 = vector.broadcast %105 : vector<8x1xf32> to vector<8x128xf32>
      %108 = arith.cmpf ogt, %89, %107 : vector<8x128xf32>
      %109 = vector.broadcast %105 : vector<8x1xf32> to vector<8x128xf32>
      %110 = arith.cmpf oeq, %89, %109 : vector<8x128xf32>
      %111 = vector.broadcast %93 : vector<1x128xi32> to vector<8x128xi32>
      %112 = vector.broadcast %106 : vector<8x1xi32> to vector<8x128xi32>
      %113 = arith.cmpi sle, %111, %112 : vector<8x128xi32>
      %114 = arith.andi %110, %113 : vector<8x128xi1>
      %115 = arith.ori %108, %114 : vector<8x128xi1>
      %116 = arith.andi %115, %43 : vector<8x128xi1>
      %117 = arith.extui %116 : vector<8x128xi1> to vector<8x128xi32>
      %118 = arith.sitofp %117 : vector<8x128xi32> to vector<8x128xf32>
      %cst_34 = arith.constant dense<0.000000e+00> : vector<128xf32>
      %119 = vector.multi_reduction <add>, %118, %cst_34 [0] : vector<8x128xf32> to vector<128xf32>
      %120 = vector.shape_cast %119 : vector<128xf32> to vector<1x128xf32>
      %121 = tpu.iota {dimensions = array<i32: 0>} : vector<8x1xi32>
      %cst_35 = arith.constant dense<0xFF800000> : vector<128xf32>
      %122 = vector.multi_reduction <maximumf>, %77, %cst_35 [0] : vector<8x128xf32> to vector<128xf32>
      %123 = vector.shape_cast %122 : vector<128xf32> to vector<1x128xf32>
      %124 = vector.broadcast %123 : vector<1x128xf32> to vector<8x128xf32>
      %125 = arith.cmpf oeq, %77, %124 : vector<8x128xf32>
      %c8_i32 = arith.constant 8 : i32
      %126 = vector.shape_cast %121 : vector<8x1xi32> to vector<8x1xi32>
      %127 = vector.broadcast %126 : vector<8x1xi32> to vector<8x128xi32>
      %128 = vector.broadcast %c8_i32 : i32 to vector<8x128xi32>
      %129 = arith.select %125, %127, %128 : vector<8x128xi1>, vector<8x128xi32>
      %cst_36 = arith.constant dense<2147483647> : vector<128xi32>
      %130 = vector.multi_reduction <minsi>, %129, %cst_36 [0] : vector<8x128xi32> to vector<128xi32>
      %131 = vector.shape_cast %130 : vector<128xi32> to vector<1x128xi32>
      %132 = vector.broadcast %121 : vector<8x1xi32> to vector<8x128xi32>
      %133 = vector.broadcast %131 : vector<1x128xi32> to vector<8x128xi32>
      %134 = arith.cmpi eq, %132, %133 : vector<8x128xi32>
      %135 = arith.extui %134 : vector<8x128xi1> to vector<8x128xi32>
      %136 = arith.sitofp %135 : vector<8x128xi32> to vector<8x128xf32>
      %cst_37 = arith.constant 1.000000e+00 : f32
      %137 = vector.broadcast %cst_37 : f32 to vector<1x128xf32>
      %138 = arith.cmpf ogt, %120, %137 : vector<1x128xf32>
      %139 = vector.shape_cast %138 : vector<1x128xi1> to vector<1x128xi1>
      %140 = vector.broadcast %139 : vector<1x128xi1> to vector<8x128xi1>
      %141 = arith.select %140, %136, %118 : vector<8x128xi1>, vector<8x128xf32>
      %cst_38 = arith.constant dense<0.000000e+00> : vector<128xf32>
      %142 = vector.multi_reduction <add>, %141, %cst_38 [0] : vector<8x128xf32> to vector<128xf32>
      %143 = vector.shape_cast %142 : vector<128xf32> to vector<1x128xf32>
      %cst_39 = arith.constant dense<0xFF800000> : vector<128xf32>
      %144 = vector.multi_reduction <maximumf>, %141, %cst_39 [0] : vector<8x128xf32> to vector<128xf32>
      %145 = vector.shape_cast %144 : vector<128xf32> to vector<1x128xf32>
      %146 = vector.broadcast %145 : vector<1x128xf32> to vector<8x128xf32>
      %147 = arith.cmpf oeq, %141, %146 : vector<8x128xf32>
      %c8_i32_40 = arith.constant 8 : i32
      %148 = vector.shape_cast %121 : vector<8x1xi32> to vector<8x1xi32>
      %149 = vector.broadcast %148 : vector<8x1xi32> to vector<8x128xi32>
      %150 = vector.broadcast %c8_i32_40 : i32 to vector<8x128xi32>
      %151 = arith.select %147, %149, %150 : vector<8x128xi1>, vector<8x128xi32>
      %cst_41 = arith.constant dense<2147483647> : vector<128xi32>
      %152 = vector.multi_reduction <minsi>, %151, %cst_41 [0] : vector<8x128xi32> to vector<128xi32>
      %153 = vector.shape_cast %152 : vector<128xi32> to vector<1x128xi32>
      %154 = vector.broadcast %121 : vector<8x1xi32> to vector<8x128xi32>
      %155 = vector.broadcast %153 : vector<1x128xi32> to vector<8x128xi32>
      %156 = arith.cmpi eq, %154, %155 : vector<8x128xi32>
      %157 = arith.extui %156 : vector<8x128xi1> to vector<8x128xi32>
      %158 = arith.sitofp %157 : vector<8x128xi32> to vector<8x128xf32>
      %159 = arith.sitofp %6 : vector<8x1xi32> to vector<8x1xf32>
      %160 = vector.broadcast %159 : vector<8x1xf32> to vector<8x128xf32>
      %161 = arith.mulf %158, %160 : vector<8x128xf32>
      %cst_42 = arith.constant dense<0.000000e+00> : vector<128xf32>
      %162 = vector.multi_reduction <add>, %161, %cst_42 [0] : vector<8x128xf32> to vector<128xf32>
      %163 = vector.shape_cast %162 : vector<128xf32> to vector<1x128xf32>
      %cst_43 = arith.constant 0.000000e+00 : f32
      %cst_44 = arith.constant 1.600000e+01 : f32
      %164 = vector.broadcast %cst_43 : f32 to vector<1x128xf32>
      %165 = arith.maximumf %164, %163 : vector<1x128xf32>
      %166 = vector.broadcast %cst_44 : f32 to vector<1x128xf32>
      %167 = arith.minimumf %166, %165 : vector<1x128xf32>
      %168 = arith.fptosi %167 : vector<1x128xf32> to vector<1x128xi32>
      %cst_45 = arith.constant dense<0.000000e+00> : vector<4x128xf32>
      %169 = tpu.matmul %10, %158, %cst_45 {dimension_numbers = #tpu.dot_dimension_numbers<[1], [0], [0], [1], [0, 0, 1, 1], [], []>} : vector<4x8xf32>, vector<8x128xf32>, vector<4x128xf32> -> vector<4x128xf32>
      %170 = arith.mulf %89, %141 : vector<8x128xf32>
      %171 = arith.mulf %77, %141 : vector<8x128xf32>
      %c0_46 = arith.constant 0 : index
      %c0_47 = arith.constant 0 : index
      %172 = vector.load %arg18[%c0_46, %c0_47] : memref<8x1xf32, #tpu.memory_space<vmem>>, vector<8x1xf32>
      %cst_48 = arith.constant dense<0xFF800000> : vector<8xf32>
      %173 = vector.multi_reduction <maximumf>, %170, %cst_48 [1] : vector<8x128xf32> to vector<8xf32>
      %174 = vector.shape_cast %173 : vector<8xf32> to vector<8x1xf32>
      %175 = arith.maximumf %172, %174 : vector<8x1xf32>
      %c0_49 = arith.constant 0 : index
      %c0_50 = arith.constant 0 : index
      %176 = vector.load %arg18[%c0_49, %c0_50] : memref<8x1xf32, #tpu.memory_space<vmem>>, vector<8x1xf32>
      tpu.vector_store %arg18[%c0_49, %c0_50], %175 {strides = array<i32>} : memref<8x1xf32, #tpu.memory_space<vmem>>, vector<8x1xf32>,
      %c0_51 = arith.constant 0 : index
      %c0_52 = arith.constant 0 : index
      %177 = vector.load %arg19[%c0_51, %c0_52] : memref<8x1xf32, #tpu.memory_space<vmem>>, vector<8x1xf32>
      %cst_53 = arith.constant dense<0xFF800000> : vector<8xf32>
      %178 = vector.multi_reduction <maximumf>, %171, %cst_53 [1] : vector<8x128xf32> to vector<8xf32>
      %179 = vector.shape_cast %178 : vector<8xf32> to vector<8x1xf32>
      %180 = arith.maximumf %177, %179 : vector<8x1xf32>
      %c0_54 = arith.constant 0 : index
      %c0_55 = arith.constant 0 : index
      %181 = vector.load %arg19[%c0_54, %c0_55] : memref<8x1xf32, #tpu.memory_space<vmem>>, vector<8x1xf32>
      tpu.vector_store %arg19[%c0_54, %c0_55], %180 {strides = array<i32>} : memref<8x1xf32, #tpu.memory_space<vmem>>, vector<8x1xf32>,
      %c0_56 = arith.constant 0 : index
      %c0_57 = arith.constant 0 : index
      %c0_58 = arith.constant 0 : index
      %182 = vector.load %arg10[%c0_56, %c0_57, %c0_58] : memref<1x1x128xi32, #tpu.memory_space<vmem>>, vector<1x1x128xi32>
      %183 = vector.shape_cast %182 : vector<1x1x128xi32> to vector<1x128xi32>
      %184 = vector.shape_cast %168 : vector<1x128xi32> to vector<1x1x128xi32>
      tpu.vector_store %arg10[%c0_56, %c0_57, %c0_58], %184 {strides = array<i32>} : memref<1x1x128xi32, #tpu.memory_space<vmem>>, vector<1x1x128xi32>,
      %c0_59 = arith.constant 0 : index
      %c0_60 = arith.constant 0 : index
      %c0_61 = arith.constant 0 : index
      %185 = vector.load %arg11[%c0_59, %c0_60, %c0_61] : memref<1x4x128xf32, #tpu.memory_space<vmem>>, vector<1x4x128xf32>
      %186 = vector.shape_cast %185 : vector<1x4x128xf32> to vector<4x128xf32>
      %187 = vector.shape_cast %169 : vector<4x128xf32> to vector<1x4x128xf32>
      tpu.vector_store %arg11[%c0_59, %c0_60, %c0_61], %187 {strides = array<i32>} : memref<1x4x128xf32, #tpu.memory_space<vmem>>, vector<1x4x128xf32>,
      %c0_62 = arith.constant 0 : index
      %c0_63 = arith.constant 0 : index
      %c0_64 = arith.constant 0 : index
      %188 = vector.load %arg12[%c0_62, %c0_63, %c0_64] : memref<1x1x128xf32, #tpu.memory_space<vmem>>, vector<1x1x128xf32>
      %189 = vector.shape_cast %188 : vector<1x1x128xf32> to vector<1x128xf32>
      %190 = vector.shape_cast %143 : vector<1x128xf32> to vector<1x1x128xf32>
      tpu.vector_store %arg12[%c0_62, %c0_63, %c0_64], %190 {strides = array<i32>} : memref<1x1x128xf32, #tpu.memory_space<vmem>>, vector<1x1x128xf32>,
      %cst_65 = arith.constant dense<0.000000e+00> : vector<128xf32>
      %191 = vector.multi_reduction <add>, %170, %cst_65 [0] : vector<8x128xf32> to vector<128xf32>
      %192 = vector.shape_cast %191 : vector<128xf32> to vector<1x128xf32>
      %c0_66 = arith.constant 0 : index
      %c0_67 = arith.constant 0 : index
      %c0_68 = arith.constant 0 : index
      %193 = vector.load %arg13[%c0_66, %c0_67, %c0_68] : memref<1x1x128xf32, #tpu.memory_space<vmem>>, vector<1x1x128xf32>
      %194 = vector.shape_cast %193 : vector<1x1x128xf32> to vector<1x128xf32>
      %195 = vector.shape_cast %192 : vector<1x128xf32> to vector<1x1x128xf32>
      tpu.vector_store %arg13[%c0_66, %c0_67, %c0_68], %195 {strides = array<i32>} : memref<1x1x128xf32, #tpu.memory_space<vmem>>, vector<1x1x128xf32>,
      %c0_69 = arith.constant 0 : index
      %c0_70 = arith.constant 0 : index
      %c0_71 = arith.constant 0 : index
      %196 = vector.load %arg14[%c0_69, %c0_70, %c0_71] : memref<1x1x128xi32, #tpu.memory_space<vmem>>, vector<1x1x128xi32>
      %197 = vector.shape_cast %196 : vector<1x1x128xi32> to vector<1x128xi32>
      %198 = vector.shape_cast %153 : vector<1x128xi32> to vector<1x1x128xi32>
      tpu.vector_store %arg14[%c0_69, %c0_70, %c0_71], %198 {strides = array<i32>} : memref<1x1x128xi32, #tpu.memory_space<vmem>>, vector<1x1x128xi32>,
      %c2_i32 = arith.constant 2 : i32
      %199 = arith.cmpi eq, %arg2, %c2_i32 : i32
      %200 = arith.extui %199 : i1 to i32
      %c0_i32_72 = arith.constant 0 : i32
      %201 = arith.cmpi ne, %200, %c0_i32_72 : i32
      scf.if %201 {
        %c0_73 = arith.constant 0 : index
        %c0_74 = arith.constant 0 : index
        %202 = vector.load %arg19[%c0_73, %c0_74] : memref<8x1xf32, #tpu.memory_space<vmem>>, vector<8x1xf32>
        %c0_75 = arith.constant 0 : index
        %c0_76 = arith.constant 0 : index
        %203 = vector.load %arg18[%c0_75, %c0_76] : memref<8x1xf32, #tpu.memory_space<vmem>>, vector<8x1xf32>
        %cst_77 = arith.constant 9.99999993E-9 : f32
        %204 = vector.broadcast %cst_77 : f32 to vector<8x1xf32>
        %205 = arith.addf %203, %204 : vector<8x1xf32>
        %206 = arith.divf %202, %205 : vector<8x1xf32>
        %c0_78 = arith.constant 0 : index
        %c0_79 = arith.constant 0 : index
        %c0_80 = arith.constant 0 : index
        %207 = vector.load %arg15[%c0_78, %c0_79, %c0_80] : memref<1x8x1xf32, #tpu.memory_space<vmem>>, vector<1x8x1xf32>
        %208 = vector.shape_cast %207 : vector<1x8x1xf32> to vector<8x1xf32>
        %209 = vector.shape_cast %206 : vector<8x1xf32> to vector<1x8x1xf32>
        tpu.vector_store %arg15[%c0_78, %c0_79, %c0_80], %209 {strides = array<i32>} : memref<1x8x1xf32, #tpu.memory_space<vmem>>, vector<1x8x1xf32>,
      } else {
      }
    } else {
    }
    return
  }
  func.func @transform_0(%arg0: i32, %arg1: i32, %arg2: i32) -> (i32, i32, i32) {
    %c0_i32 = arith.constant 0 : i32
    %c0_i32_0 = arith.constant 0 : i32
    return %arg0, %c0_i32, %arg2 : i32, i32, i32
  }
  func.func @transform_1(%arg0: i32, %arg1: i32, %arg2: i32) -> (i32, i32, i32) {
    %c0_i32 = arith.constant 0 : i32
    %c0_i32_0 = arith.constant 0 : i32
    return %arg0, %c0_i32, %arg2 : i32, i32, i32
  }
  func.func @transform_2(%arg0: i32, %arg1: i32, %arg2: i32) -> (i32, i32) {
    %c0_i32 = arith.constant 0 : i32
    %c0_i32_0 = arith.constant 0 : i32
    return %c0_i32, %arg2 : i32, i32
  }
  func.func @transform_3(%arg0: i32, %arg1: i32, %arg2: i32) -> (i32, i32, i32) {
    %c0_i32 = arith.constant 0 : i32
    %c0_i32_0 = arith.constant 0 : i32
    %c0_i32_1 = arith.constant 0 : i32
    return %arg0, %c0_i32, %c0_i32_0 : i32, i32, i32
  }
  func.func @transform_4(%arg0: i32, %arg1: i32, %arg2: i32) -> (i32, i32, i32) {
    %c0_i32 = arith.constant 0 : i32
    %c0_i32_0 = arith.constant 0 : i32
    %c0_i32_1 = arith.constant 0 : i32
    return %arg0, %c0_i32, %c0_i32_0 : i32, i32, i32
  }
  func.func @transform_5(%arg0: i32, %arg1: i32, %arg2: i32) -> (i32, i32, i32) {
    %c0_i32 = arith.constant 0 : i32
    %c0_i32_0 = arith.constant 0 : i32
    %c0_i32_1 = arith.constant 0 : i32
    return %arg0, %c0_i32, %c0_i32_0 : i32, i32, i32
  }
  func.func @transform_6(%arg0: i32, %arg1: i32, %arg2: i32) -> (i32, i32, i32) {
    %c0_i32 = arith.constant 0 : i32
    %c0_i32_0 = arith.constant 0 : i32
    %c0_i32_1 = arith.constant 0 : i32
    return %arg0, %c0_i32, %c0_i32_0 : i32, i32, i32
  }
  func.func @transform_7(%arg0: i32, %arg1: i32, %arg2: i32) -> (i32, i32, i32) {
    %0 = arith.muli %arg1, %arg2 : i32
    %c0_i32 = arith.constant 0 : i32
    %c0_i32_0 = arith.constant 0 : i32
    return %arg0, %c0_i32, %0 : i32, i32, i32
  }
  func.func @transform_8(%arg0: i32, %arg1: i32, %arg2: i32) -> (i32, i32, i32) {
    %0 = arith.muli %arg1, %arg2 : i32
    %c0_i32 = arith.constant 0 : i32
    %c0_i32_0 = arith.constant 0 : i32
    return %arg0, %c0_i32, %0 : i32, i32, i32
  }
  func.func @transform_9(%arg0: i32, %arg1: i32, %arg2: i32) -> (i32, i32, i32) {
    %0 = arith.muli %arg1, %arg2 : i32
    %c0_i32 = arith.constant 0 : i32
    %c0_i32_0 = arith.constant 0 : i32
    return %arg0, %c0_i32, %0 : i32, i32, i32
  }
  func.func @transform_10(%arg0: i32, %arg1: i32, %arg2: i32) -> (i32, i32, i32) {
    %0 = arith.muli %arg1, %arg2 : i32
    %c0_i32 = arith.constant 0 : i32
    %c0_i32_0 = arith.constant 0 : i32
    return %arg0, %c0_i32, %0 : i32, i32, i32
  }
  func.func @transform_11(%arg0: i32, %arg1: i32, %arg2: i32) -> (i32, i32, i32) {
    %0 = arith.muli %arg1, %arg2 : i32
    %c0_i32 = arith.constant 0 : i32
    %c0_i32_0 = arith.constant 0 : i32
    return %arg0, %c0_i32, %0 : i32, i32, i32
  }
  func.func @transform_12(%arg0: i32, %arg1: i32, %arg2: i32) -> (i32, i32, i32) {
    %c0_i32 = arith.constant 0 : i32
    %c0_i32_0 = arith.constant 0 : i32
    %c0_i32_1 = arith.constant 0 : i32
    return %arg0, %c0_i32, %c0_i32_0 : i32, i32, i32
  }
}

</mosaic_0001>

<bundles_post_ra>
// kernel: tpu_custom_call.1
= control target key start
LH: loop header
LB: loop body
LE: loop exit
PB: predicated region body
PF: predicated region fallthrough
CT: control target
= control target key end

     0   :  { %s2779_s0 = inlined_call_operand.hbm [shape: f32[2,16,384], index: 0, kind: input, shape index: {}]   ;;  %s2780_s1 = inlined_call_operand.vmem [shape: f32[2,4,384], index: 1, kind: input, shape index: {}]   ;;  %s2781_s2 = inlined_call_operand.vmem [shape: f32[2,384], index: 2, kind: input, shape index: {}]   ;;  %s2782_s3 = inlined_call_operand.vmem [shape: s32[2,8,1], index: 3, kind: input, shape index: {}]   ;;  %s2783_s4 = inlined_call_operand.vmem [shape: f32[2,8,4], index: 4, kind: input, shape index: {}]   ;;  %s2784_s5 = inlined_call_operand.vmem [shape: f32[2,4,8], index: 5, kind: input, shape index: {}]   ;;  %s2785_s6 = inlined_call_operand.vmem [shape: f32[2,8,1], index: 6, kind: input, shape index: {}]   ;;  %s2786_s7 = inlined_call_operand.hbm [shape: s32[2,1,384], index: 7, kind: output, shape index: {0}]   ;;  %s2787_s8 = inlined_call_operand.hbm [shape: f32[2,4,384], index: 8, kind: output, shape index: {1}]   ;;  %s2788_s9 = inlined_call_operand.hbm [shape: f32[2,1,384], index: 9, kind: output, shape index: {2}]   ;;  %s2789_s10 = inlined_call_operand.hbm [shape: f32[2,1,384], index: 10, kind: output, shape index: {3}]   ;;  %s2790_s11 = inlined_call_operand.hbm [shape: s32[2,1,384], index: 11, kind: output, shape index: {4}]   ;;  %s2791_s12 = inlined_call_operand.vmem [shape: f32[2,8,1], index: 12, kind: output, shape index: {5}]  }
   0x1   :  { %2809 = sst [smem:[#allocation30_spill]] %s2779_s0 }
   0x2   :  { %2810 = sst [smem:[#allocation31_spill]] %s2780_s1 }
   0x3   :  { %2811 = sst [smem:[#allocation32_spill]] %s2781_s2 }
   0x4   :  { %2812 = sst [smem:[#allocation33_spill]] %s2782_s3 }
   0x5   :  { %2813 = sst [smem:[#allocation34_spill]] %s2785_s6 }
   0x6   :  { %2814 = sst [smem:[#allocation35_spill]] %s2786_s7 }
   0x7   :  { %2815 = sst [smem:[#allocation36_spill]] %s2787_s8 }
   0x8   :  { %2816 = sst [smem:[#allocation37_spill]] %s2788_s9 }
   0x9   :  { %2817 = sst [smem:[#allocation38_spill]] %s2789_s10 }
   0xa   :  { %2818 = sst [smem:[#allocation39_spill]] %s2790_s11 }
   0xb   :  { %18 = vsyncpa [#allocation7], 0 }
   0xc   :  { %20 = vsyncpa [#allocation7 + $0x1], 0 }
   0xd   :  { %21 = vsyncpa [#allocation8], 0 }
   0xe   :  { %23 = vsyncpa [#allocation8 + $0x1], 0 }
   0xf   :  { %24 = vsyncpa [#allocation11], 0 }
  0x10   :  { %26 = vsyncpa [#allocation11 + $0x1], 0 }
  0x11   :  { %27 = vsyncpa [#allocation14], 0 }
  0x12   :  { %29 = vsyncpa [#allocation14 + $0x1], 0  ;;  %s2229_s21 = smov 0   ;;  %s2231_s22 = smov 0  }
  0x13   :  { %s2233_s23 = smov 0   ;;  %s2235_s24 = smov 0  }
  0x14   :  { %s2237_s25 = smov 0   ;;  %s2239_s26 = smov 0  }
  0x15   :  { %s2241_s27 = smov 0   ;;  %s2243_s28 = smov 0  }
  0x16   :  { %s2245_s29 = smov 0   ;;  %s2247_s30 = smov 0  }
  0x17   :  { %s2249_s13 = smov 0   ;;  %s2251_s14 = smov 0  }
  0x18   :  { %2819 = sst [smem:[#allocation20_spill]] %s2251_s14  ;;  %s2253_s15 = smov 0  }
  0x19 LB: > { %s2821_s14 = sld [smem:[#allocation20_spill]]  ;;  %2823 = sst [smem:[#allocation21_spill]] %s2096_s28  ;;  %s2116_s15 = sphi %s2253_s15, %s35_s15   ;;  %s2108_s13 = sphi %s2249_s13, %s2876_s13   ;;  %s2104_s30 = sphi %s2247_s30, %s2875_s30   ;;  %s2100_s29 = sphi %s2245_s29, %s2874_s29   ;;  %s2096_s28 = sphi %s2243_s28, %s2873_s28   ;;  %s2092_s27 = sphi %s2241_s27, %s2872_s27   ;;  %s2088_s26 = sphi %s2239_s26, %s2871_s26   ;;  %s2084_s25 = sphi %s2237_s25, %s2882_s25   ;;  %s2080_s24 = sphi %s2235_s24, %s2881_s24   ;;  %s2076_s23 = sphi %s2233_s23, %s2880_s23   ;;  %s2072_s22 = sphi %s2231_s22, %s2879_s22   ;;  %s2068_s21 = sphi %s2229_s21, %s2878_s21  }
  0x1a   : > { %2822 = sst [smem:[#allocation20_spill]] %s2088_s26  ;;  %s2293_s16 = sadd.s32 4294967295, %s2116_s15  }
  0x1b   : > { %2824 = sst [smem:[#allocation22_spill]] %s2104_s30  ;;  %s47_s18 = sadd.s32 1, %s2104_s30 }
  0x1c   : > { %2825 = sst [smem:[#allocation23_spill]] %s2108_s13  ;;  %s50_s19 = sadd.s32 1, %s2108_s13 }
  0x1d   : > { %p48_p0 = scmp.ge.s32.totalorder %s47_s18, 3  ;;  %p70_p1 = scmp.ne.s32.totalorder %s2088_s26, %s2084_s25 }
  0x1e   : > { %p71_p2 = scmp.eq.s32.totalorder %s2116_s15, 0  ;;  %p76_p4 = scmp.ne.s32.totalorder %s2084_s25, %s2080_s24 }
  0x1f   : > { %2826 = sst [smem:[#allocation24_spill]] %s2821_s14  ;;  %s54_s20 = sadd.s32 1, %s2821_s14 }
  0x20   : > { %s2885_s18 = smov (%p48_p0, %s47_s18), 0  ;;  %s2887_s19 = smov (!%p48_p0, %s50_s19), %s2108_s13 }
  0x21   : > { %2827 = sst [smem:[#allocation25_spill]] %s2885_s18  ;;  %s59_s9 = ssub.s32 %s2104_s30, %s2885_s18 }
  0x22   : > { %p52_p3 = scmp.ge.s32.totalorder %s2887_s19, 2  ;;  %p2309_p5 = por %p71_p2, %p70_p1 }
  0x23   : > { %p77_p6 = scmp.eq.s32.totalorder %s2293_s16, 0  ;;  %s244_s7 = smul.u32 %s2104_s30, %s2108_s13 }
  0x24   : > { %s2889_s19 = smov (%p52_p3, %s2887_s19), 0  ;;  %s2891_s20 = smov (!%p52_p3, %s54_s20), %s2821_s14 }
  0x25   : > { %2829 = sst [smem:[#allocation26_spill]] %s2889_s19  ;;  %p2317_p7 = por %p77_p6, %p76_p4 }
  0x26   : > { %p56_p8 = scmp.ge.s32.totalorder %s2891_s20, 2  ;;  %s245_s24 = smul.u32 %s2889_s19, %s2885_s18 }
  0x27   : > { %s251_s10 = sadd.s32 1, %s2076_s23  ;;  %p261_p9 = scmp.ne.s32.totalorder %s2076_s23, %s2072_s22 }
  0x28   : > { %s2893_s20 = smov (%p56_p8, %s2891_s20), 0  ;;  %s247_s8 = ssub.s32 %s244_s7, %s245_s24 }
  0x29   : > { %2831 = sst [smem:[#allocation27_spill]] %s2893_s20  ;;  %p262_p10 = scmp.eq.s32.totalorder %s2293_s16, 11 }
  0x2a   : > { %s58_s28 = ssub.s32 %s2821_s14, %s2893_s20  ;;  %p267_p11 = scmp.ne.s32.totalorder %s2072_s22, %s2068_s21 }
  0x2b   : > { %s60_s2 = sor.u32 %s59_s9, %s58_s28  ;;  %s248_s13 = sor.u32 %s247_s8, %s58_s28 }
  0x2c   : > { %p61_p12 = scmp.eq.s32.totalorder %s60_s2, 0  ;;  %p249_p13 = scmp.eq.s32.totalorder %s248_s13, 0 }
  0x2d   : > { %p2335_p0 = por %p262_p10, %p261_p9  ;;  %s2833_s18 = sadd.s32 4294967294, %s2116_s15  }
  0x2e   : > { %p268_p1 = scmp.eq.s32.totalorder %s2833_s18, 11  ;;  %s2834_s1 = sadd.s32 1, %s2088_s26 }
  0x2f   : > { %s2832_s19 = scalar_select %p2335_p0, 1, 0 }
  0x30   : > { %s2344_s6 = scalar_select %p61_p12, %s2088_s26, %s2834_s1  }
  0x31   : > { %s2347_s7 = scalar_select %p249_p13, %s2076_s23, %s251_s10  }
  0x32   : > { %2835 = sst [smem:[#allocation28_spill]] %s2344_s6  ;;  %p2349_p2 = por %p268_p1, %p267_p11 }
  0x33   : > { %2836 = sst [smem:[#allocation29_spill]] %s2347_s7  ;;  %p1627_p3 = scmp.lt.s32.totalorder %s2116_s15, 12 }
  0x34   : > { %s2837_s24 = scalar_select %p2349_p2, 1, 0 }
  0x35   : > { %s434_s9 = sand.u32 1, %s2088_s26   ;;  %s1586_s2 = smul.u32 6, %s2821_s14 }
  0x36   : > { %s1533_s8 = sshll.u32 %s434_s9, 4  ;;  %p2358_p4 = pnand %p1627_p3, %p2309_p5 }
  0x37   : > { %s438_s28 = scalar_lea.vmem [#allocation6], %s1533_s8  ;;  %s443_s1 = sadd.s32 %s2104_s30, %s1586_s2 }
  0x38   : > { %s446_s13 = sshll.u32 %s438_s28, 4  ;;  %s1534_s10 = sshll.u32 %s443_s1, 7  ;;  %s2363_s13 = int_to_ptr.vmem [resolvable:$true] %s446_s13 }
  0x39   : > { %s2839_s0 = sld [smem:[#allocation30_spill]]  ;;  %s2370_s17 = scalar_lea.sflag [#allocation7], %s434_s9 }
  0x3a   : > { %p1810_p6 = pneg %p2358_p4 }
  0x3f   : > { %s2368_s7 = scalar_lea.hbm %s2839_s0, %s1534_s10  ;;  %s1813_s6 = scalar_lea.hbm %s2839_s0, 1536 }
  0x40   : > { %s1808_s8 = scalar_lea.hbm %s2368_s7, 256  ;;  %p1814_p10 = scmp.lt.u32.totalorder %s2368_s7, %s2839_s0 }
  0x41   : > { %p1809_p5 = scmp.ne.s32.totalorder %s2368_s7, %s1808_s8  ;;  %p1815_p11 = scmp.lt.u32.totalorder %s1813_s6, %s1808_s8 }
  0x42   : > { %p1817_p13 = scmp.lt.u32.totalorder %s1808_s8, %s2368_s7 }
  0x43   : > { %p1811_p8 = pnand %p1810_p6, %p1809_p5  ;;  %p1816_p12 = por %p1815_p11, %p1814_p10 }
  0x45   : > { %p1812_p9 = pneg %p1811_p8  ;;  %p1818_p1 = por %p1817_p13, %p1816_p12 }
  0x47   : > { %p1819_p3 = pnand %p1818_p1, %p1812_p9 }
  0x49   : > { %1822 = shalt.err (!%p1819_p3)
}
  0x4a   : > { %s1823_s9 = scalar_lea.vmem %s2363_s13, 256  ;;  %s2138_s18 = smov [#allocation6]  }
  0x4b   : > { %p1824_p5 = scmp.ne.s32.totalorder %s2363_s13, %s1823_s9  ;;  %s1828_s2 = sshll.u32 %s2138_s18, 4  ;;  %s1829_s2 = int_to_ptr.vmem [resolvable:$false] %s1828_s2 }
  0x4c   : > { %s1830_s28 = scalar_lea.vmem %s1829_s2, 512  ;;  %p1831_p0 = scmp.lt.s32.totalorder %s2363_s13, %s1829_s2 }
  0x4d   : > { %p1826_p8 = pnand %p1824_p5, %p1810_p6  ;;  %p1832_p10 = scmp.lt.s32.totalorder %s1830_s28, %s1823_s9 }
  0x4f   : > { %p1827_p2 = pneg %p1826_p8  ;;  %p1833_p11 = por %p1832_p10, %p1831_p0 }
  0x51   : > { %p1834_p12 = pnand %p1833_p11, %p1827_p2 }
  0x53   : > { %1837 = shalt.err (!%p1834_p12)
}
  0x54   : > { %s2139_s8 = smov 384   ;;  %s2140_s6 = smov 128  }
  0x55   : > { %s2141_s1 = smov 8   ;;  %p1535_p6 = scmp.ge.s32.totalorder %s2116_s15, 1 }
  0x56   : > { %1610 = dma.hbm_to_vmem [thread:$0]  (!%p2358_p4), %s2368_s7, 256, %s2363_s13, %s2370_s17, %s2139_s8, %s2140_s6, %s2141_s1  }
  0x57   : > { %p500_p9 = scmp.lt.s32.totalorder %s2116_s15, 13 }
  0x59   : > { %p501_p13 = pnand %p1535_p6, %p500_p9 }
  0x5a   : > { %s506_s10 = sand.u32 (!%p501_p13), 1, %s2084_s25  }
  0x5b   : > { %504 = sbr.rel (%p501_p13) target bundleno = 1521 (0x5f1), region = 48  ;;  %s2401_s9 = sshll.u32 (!%p501_p13), %s506_s10, 4 }
  0x5c   : > { %s507_s18 = scalar_lea.sflag (!%p501_p13), [#allocation7], %s506_s10  ;;  %s510_s2 = scalar_lea.vmem (!%p501_p13), [#allocation6], %s2401_s9 }
  0x62   : > { %2051 = dma.done.wait (%p2317_p7), %s507_s18, 256  }
  0x63   : > { %2053 = vsyncadd (%p2317_p7), %s507_s18, 4294967040  ;;  %p599_p0 = scmp.lt.s32.totalorder %s2100_s29, 1  ;;  %v644_v0 = vlaneseq  ;;  %v2142_v1 = vmov 0   ;;  %s2410_s20 = sand.u32 1, %s2072_s22   ;;  %v2143_v2 = vmov 0.0|0.0   ;;  %v636_v8 = vld [vmem:[%s510_s2] sm:$0xff] }
  0x64   : > { %1793 = vset.pattern.permute.xlu0 %v2142_v1  ;;  %1583 = vmatprep.subr.bf16.mxu0 %v2143_v2  ;;  %s1547_s7 = sshll.u32 %s2092_s27, 7  ;;  %s2840_s3 = sld [smem:[#allocation33_spill]]  ;;  %v637_v9 = vld [vmem:[%s510_s2 + $0x8] sm:$0xff]  ;;  %vm2144_vm0 = vmmov 0   ;;  %v2145_v12 = vmov 0.0   ;;  %v2147_v13 = vmov 1  }
  0x65   : > { %s2414_s13 = scalar_select %p599_p0, %s2100_s29, 1  ;;  %v2417_v3 = vand.u32 127, %v644_v0  ;;  %v829_v4 = vstv %s1547_s7  ;;  %1794 = vset.pattern.permute.xlu1 %v2142_v1  ;;  %v1584_v11 = vpack.c.bf16 %v637_v9, %v636_v8  ;;  %1575 = vmatprep.mubr.msk.f32.mxu0 %vm2144_vm0, %v2145_v12  ;;  %v2148_v14 = vmov 2  }
  0x66   : > { %s2146_s0 = smov 2   ;;  %vm749_vm1 = vcmask 130048   ;;  %s2841_s2 = sld [smem:[#allocation34_spill]]  ;;  %v2150_v20 = vmov 3   ;;  %v2461_v27 = vshrl.u32 %v644_v0, 7 }
  0x67   : > { %s2421_s17 = sshll.u32 %s2414_s13, 3  ;;  %s1542_s28 = sshll.u32 %s2414_s13, 2  ;;  %v2425_v5 = vadd.s32 %v829_v4, %v2417_v3  ;;  %1585 = vmatpush3.bf16.msra.mxu0 %v1584_v11 }
  0x68   : > { %s622_s18 = scalar_lea.vmem %s2784_s5, %s1542_s28  ;;  %s635_s11 = scalar_lea.vmem %s2791_s12, %s2421_s17  ;;  %v656_v30 = vsub.s32 1, %v2461_v27  ;;  %v646_v31 = vsub.s32 0, %v2461_v27  ;;  %v686_v32 = vsub.s32 2, %v2461_v27  ;;  %v698_v33 = vsub.s32 3, %v2461_v27 }
  0x69   : > { %s618_s26 = scalar_lea.vmem %s2783_s4, %s2421_s17  ;;  %v2444_v7 = vld [vmem:[%s622_s18] sm:$0xf]  ;;  %p601_p7 = scmp.lt.s32.totalorder %s2092_s27, 2 }
  0x6a   : > { %s614_s1 = scalar_lea.vmem %s2840_s3, %s2421_s17  ;;  %v641_v10 = vld [vmem:[%s618_s26] sm:$0xff]  ;;  %s2149_s26 = smov 127  }
  0x6b   : > { %v2442_v6 = vld [vmem:[%s614_s1] sm:$0xff]  ;;  %s1587_s8 = smul.u32 3, %s2414_s13  ;;  %s2842_s7 = sld [smem:[#allocation31_spill]] }
  0x6c   : > { %744 = vperm.xlu0 %1793, %v2442_v6   ;;  %s626_s28 = scalar_lea.vmem %s2841_s2, %s2421_s17  ;;  %s2843_s14 = sld [smem:[#allocation32_spill]] }
  0x6d   : > { %v643_v19 = vld [vmem:[%s626_s28] sm:$0xff]  ;;  %s2457_s6 = scalar_select %p601_p7, %s2092_s27, 2 }
  0x6e   : > { %vm677_vm3 = vcmp.gt.f32.partialorder %v643_v19, 0.5  ;;  %s2807_s28 = scalar_lea.vmem [#allocation9], %s2410_s20  ;;  %s2805_s9 = scalar_lea.vmem [#allocation15], %s2410_s20 }
  0x6f   : > { %v678_v21 = vsel %vm677_vm3, 1, %v2142_v1  ;;  %s604_s1 = sadd.s32 %s1587_s8, %s2457_s6  ;;  %s1539_s13 = sshll.u32 %s2457_s6, 1 }
  0x70   : > { %709 = vrot.lane.b32.xlu0 %v641_v10, %s2146_s0  ;;  %s1538_s10 = sshll.u32 %s604_s1, 2  ;;  %s2846_s8 = sshll.u32 %s2410_s20, 2 }
  0x71   : > { %1795 = vset.pattern.permute.xlu0 %v2147_v13  ;;  %s606_s0 = scalar_lea.vmem %s2842_s7, %s1538_s10  ;;  %s2492_s6 = scalar_lea.vmem [#allocation10], %s2846_s8 }
  0x72   : > { %v638_v28 = vld [vmem:[%s606_s0] sm:$0xf]  ;;  %s610_s2 = scalar_lea.vmem %s2843_s14, %s1539_s13  ;;  %s2806_s1 = scalar_lea.vmem [#allocation12], %s2410_s20 }
  0x73   : > { %v719_v34 = vrot.slane %v638_v28, 6  ;;  %v704_v35 = vrot.slane %v638_v28, %v656_v30  ;;  %v692_v36 = vrot.slane %v638_v28, %v646_v31  ;;  %v687_v37 = vrot.slane %v638_v28, %v686_v32  ;;  %v639_v50 = vld [vmem:[%s610_s2] sm:$0x3]  ;;  %s2808_s10 = scalar_lea.vmem [#allocation13], %s2410_s20  ;;  %s2847_s18 = sld [smem:[#allocation21_spill]] }
  0x74   : > { %659 = vperm.xlu0 %1795, %v641_v10   ;;  %v699_v38 = vrot.slane %v638_v28, %v698_v33  ;;  %v647_v54 = vrot.slane %v639_v50, %v646_v31  ;;  %v657_v55 = vrot.slane %v639_v50, %v656_v30 }
  0x75   : > { %v721_v40 = vsub.f32 %v638_v28, %v719_v34 }
  0x77   : > { %v723_v46 = vrot.slane %v721_v40, 1 }
  0x78   : > { %1798 = vset.pattern.permute.xlu0 %v2148_v14 }
  0x79   : > { %v725_v49 = vmul.f32 %v723_v46, %v721_v40  ;;  %p1548_p2 = scmp.ne.s32.totalorder %s2847_s18, 0 }
  0x7a   : > { %p1549_p4 = scmp.ne.s32.totalorder (!%p1548_p2), %s2092_s27, 0 }
  0x7b   : > { %v734_v53 = vrot.slane %v725_v49, %v686_v32 }
  0xeb   : > { %v745_v15 = vpop.permute.xlu0 %744 }
  0xec   : > { %vm746_vm2 = vcmp.eq.s32.totalorder %v2417_v3, %v745_v15 }
  0xed   : > { %v1545_v16 = vsel %vm746_vm2, 1.0, %v2145_v12 }
  0xee   : > { %1576 = vmatmul.mubr.msk.f32.vlgmr.msra.gmra.mrb[0].mxu0 %vm749_vm1, %v1545_v16 }
  0xef   : > { %v710_v17 = vpop.permute.xlu0 %709 }
  0xf0   : > { %v712_v18 = vsub.f32 %v641_v10, %v710_v17 }
  0xf2   : > { %714 = vrot.lane.b32.xlu1 %v712_v18, %s2149_s26 }
  0xf3   : > { %v660_v39 = vpop.permute.xlu0 %659 }
  0xf4   : > { %v705_v42 = vmax.f32 %v660_v39, %v704_v35  ;;  %v662_v63 = vsub.f32 %v657_v55, %v660_v39 }
  0xf6   : > { %650 = vperm.xlu1 %1794, %v641_v10  }
  0xfa   : > { %1796 = vset.pattern.permute.xlu1 %v2148_v14 }
  0xfb   : > { %665 = vperm.xlu1 %1796, %v641_v10  }
  0xff   : > { %1797 = vset.pattern.permute.xlu1 %v2150_v20 }
 0x100   : > { %670 = vperm.xlu1 %1797, %v641_v10  }
 0x104   : > { %1799 = vset.pattern.permute.xlu1 %v2142_v1 }
 0x105   : > { %680 = vperm.xlu1 %1799, %v678_v21  }
 0x164   : > { %v715_v22 = vpop.permute.xlu1 %714 }
 0x165   : > { %v717_v23 = vmul.f32 %v715_v22, %v712_v18 }
 0x167   : > { %728 = vperm.xlu0 %1798, %v717_v23  }
 0x16b   : > { %1800 = vset.pattern.permute.xlu0 %v2142_v1 }
 0x175   : > { %v651_v26 = vpop.permute.xlu1 %650 }
 0x176   : > { %v693_v43 = vmax.f32 %v651_v26, %v692_v36  ;;  %v653_v60 = vsub.f32 %v647_v54, %v651_v26 }
 0x178   : > { %v663_v2 = vmin.f32 %v653_v60, %v662_v63 }
 0x17a   : > { %v666_v29 = vpop.permute.xlu1 %665 }
 0x17b   : > { %v688_v44 = vmin.f32 %v666_v29, %v687_v37  ;;  %v668_v61 = vsub.f32 %v666_v29, %v647_v54 }
 0x17d   : > { %v694_v47 = vsub.f32 %v688_v44, %v693_v43 }
 0x17f   : > { %v671_v41 = vpop.permute.xlu1 %670  ;;  %v695_v51 = vmax.f32 %v694_v47, 0.0 }
 0x180   : > { %v700_v45 = vmin.f32 %v671_v41, %v699_v38  ;;  %v673_v62 = vsub.f32 %v671_v41, %v657_v55 }
 0x182   : > { %v706_v48 = vsub.f32 %v700_v45, %v705_v42  ;;  %v674_v1 = vmin.f32 %v668_v61, %v673_v62 }
 0x184   : > { %v707_v52 = vmax.f32 %v706_v48, 0.0  ;;  %v675_v4 = vmin.f32 %v663_v2, %v674_v1  ;;  %v681_v8 = vpop.permute.xlu1 %680 }
 0x185   : > { %vm682_vm5 = vcmp.eq.s32.totalorder %v681_v8, 1 }
 0x186   : > { %v708_v57 = vmul.f32 %v707_v52, %v695_v51  ;;  %vm676_vm4 = vcmp.gt.f32.partialorder %v675_v4, 1e-08 }
 0x187   : > { %vm2474_vm6 = vmand %vm676_vm4, %vm682_vm5 }
 0x1c1   : > { %v2452_v24 = vpop.f32.mrb[0].mxu0 }
 0x1c2   : > { %v1577_v25 = vpop.f32.mrb[1].mxu0 }
 0x1e6   : > { %v729_v56 = vpop.permute.xlu0 %728 }
 0x1e7   : > { %v735_v58 = vadd.f32 %v734_v53, %v729_v56 }
 0x1e9   : > { %v736_v59 = vsub.f32 %v735_v58, %v708_v57 }
 0x1eb   : > { %v737_v0 = vadd.f32 1e-07, %v736_v59 }
 0x1ed   : > { %1801 = vrcp.f32 %v737_v0 }
 0x1f7   : > { %v1802_v9 = vpop.eup %1801 }
 0x1f8   : > { %v739_v10 = vmul.f32 %v1802_v9, %v708_v57 }
 0x1fa   : > { %v2480_v12 = vsel %vm2474_vm6, %v739_v10, 0.0 }
 0x1fb   : > { %v823_v13 = vmul.f32 %v2480_v12, %v2480_v12 }
 0x1fd   : > { %v824_v14 = vmul.f32 %v823_v13, %v823_v13  ;;  %834 = sbr.rel (%p1548_p2) target bundleno = 972 (0x3cc), region = 56 }
 0x1ff   : > { %v825_v15 = vmul.f32 %v824_v14, %v823_v13 }
 0x201   : > { %v826_v16 = vmul.f32 %v825_v15, %v2452_v24 }
 0x203   : > { %v2487_v17 = vsel %vm2474_vm6, %v826_v16, 0.0  }
 0x204   : > { %838 = sbr.rel (%p1549_p4) target bundleno = 523 (0x20b), region = 60  ;;  %v2151_v18 = vmov (!%p1549_p4), -inf   ;;  %v2152_v19 = vmov (!%p1549_p4), 1073741824  }
 0x205   : > { %839 = vst [vmem:[#allocation2] sm:$0xff] (!%p1549_p4), %v2151_v18  ;;  %840 = vst [vmem:[#allocation3] sm:$0xff] (!%p1549_p4), %v2152_v19 }
 0x20b PF: > { %v2118_v22 = vmov 1073741824   ;;  %v2122_v23 = vmov -inf   ;;  %v2126_v24 = vmov %v2487_v17   ;;  %s2500_s7 = smov 0  }
 0x20c   : > { %v841_v20 = vld [vmem:[#allocation2] sm:$0xff]   ;;  %v842_v21 = vld [vmem:[#allocation3] sm:$0xff] }
 0x20d   : > { %v2130_v25 = vmov %v841_v20  }
 0x20e LB: >> { %v853_v26 = vmax.f32 %v2132_v25, %v2128_v24  ;;  %v880_v28 = vstv %s2136_s7  ;;  %s848_s7 = sadd.s32 1, %s2136_s7   ;;  %s2136_s7 = sphi %s2500_s7, %s848_s7   ;;  %v2132_v25 = vphi %v2130_v25, %v882_v25   ;;  %v2128_v24 = vphi %v2126_v24, %v883_v24   ;;  %v2124_v23 = vphi %v2122_v23, %v2123_v23   ;;  %v2120_v22 = vphi %v2118_v22, %v2119_v22  }
 0x20f   : >> { %vm2507_vm7 = vcmp.eq.s32.totalorder %v2417_v3, %v880_v28  ;;  %p845_p1 = scmp.ge.s32.totalorder %s848_s7, 10  }
 0x210   : >> { %854 = vmax.xlane.f32.xlu0 %v853_v26 }
 0x29d   : >> { %v855_v30 = vpop.xlane.xlu0 %854 }
 0x29e   : >> { %vm856_vm8 = vcmp.eq.f32.partialorder %v2132_v25, %v855_v30  ;;  %vm857_vm9 = vcmp.eq.f32.partialorder %v2128_v24, %v855_v30  ;;  %v886_v31 = vsel %vm2507_vm7, %v855_v30, %v2124_v23  }
 0x29f   : >> { %v858_v32 = vsel %vm856_vm8, %v842_v21, 1073741824  ;;  %v859_v33 = vsel %vm857_vm9, %v2425_v5, 1073741824  ;;  %v2123_v23 = vmov %v886_v31   ;;  %888 = vst [vmem:[#allocation2] sm:$0xff] (%p845_p1), %v886_v31 }
 0x2a0   : >> { %vm860_vm10 = vcmp.lt.s32.totalorder %v858_v32, %v859_v33 }
 0x2a1   : >> { %v861_v34 = vsel %vm860_vm10, %v858_v32, %v859_v33 }
 0x2a2   : >> { %v863_v35 = vshra.s32 %v861_v34, 16  ;;  %v862_v37 = vand.u32 65535, %v861_v34 }
 0x2a4   : >> { %v865_v36 = vcvt.s32.f32 %v863_v35  ;;  %v864_v39 = vcvt.s32.f32 %v862_v37 }
 0x2a6   : >> { %866 = vmin.xlane.f32.xlu0 %v865_v36 }
 0x333   : >> { %v867_v38 = vpop.xlane.xlu0 %866 }
 0x334   : >> { %vm868_vm11 = vcmp.eq.f32.partialorder %v865_v36, %v867_v38  ;;  %v873_v41 = vcvt.f32.s32 %v867_v38 }
 0x335   : >> { %v869_v40 = vsel %vm868_vm11, %v864_v39, inf }
 0x336   : >> { %870 = vmin.xlane.f32.xlu1 %v869_v40  ;;  %v874_v43 = vshll.u32 %v873_v41, 16 }
 0x3c3   : >> { %v871_v42 = vpop.xlane.xlu1 %870 }
 0x3c4   : >> { %v872_v44 = vcvt.f32.s32 %v871_v42 }
 0x3c5   : > { %847 = sbr.rel (!%p845_p1) target bundleno = 526 (0x20e), region = 214 }
 0x3c6   : >> { %v875_v45 = vadd.s32 %v874_v43, %v872_v44 }
 0x3c8   : >> { %vm876_vm12 = vcmp.eq.s32.totalorder %v842_v21, %v875_v45  ;;  %vm877_vm13 = vcmp.eq.s32.totalorder %v2425_v5, %v875_v45  ;;  %v887_v46 = vsel %vm2507_vm7, %v875_v45, %v2120_v22  }
 0x3c9   : >> { %vm878_vm14 = vmand %vm856_vm8, %vm876_vm12  ;;  %v2119_v22 = vmov %v887_v46   ;;  %889 = vst [vmem:[#allocation3] sm:$0xff] (%p845_p1), %v887_v46 }
 0x3ca   : >> { %vm879_vm15 = vmand %vm857_vm9, %vm877_vm13  ;;  %v882_v25 = vsel %vm878_vm14, -inf, %v2132_v25  }
 0x3cb   : >> { %v883_v24 = vsel %vm879_vm15, -inf, %v2128_v24  }
 0x3cc PF: > { %s2850_s0 = sld [smem:[#allocation21_spill]] }
 0x3d2   : > { %p1550_p3 = scmp.ne.s32.totalorder %s2850_s0, 1 }
 0x3d3   : > { %p1551_p5 = scmp.ne.s32.totalorder (!%p1550_p3), %s2092_s27, 0 }
 0x3d4   : > { %893 = sbr.rel (%p1550_p3) target bundleno = 1388 (0x56c), region = 71 }
 0x3db   : > { %897 = sbr.rel (%p1551_p5) target bundleno = 994 (0x3e2), region = 75  ;;  %vm898_vm0 = vcmask (!%p1551_p5), 7168   ;;  %v2153_v47 = vmov (!%p1551_p5), 0.0  }
 0x3dc   : > { %899 = vst.msk [vmem:[#allocation4] sm:$0xff] (!%p1551_p5), %vm898_vm0, %v2153_v47  ;;  %900 = vst.msk [vmem:[#allocation5] sm:$0xff] (!%p1551_p5), %vm898_vm0, %v2153_v47 }
 0x3e2 PF: > { %v901_v48 = vld [vmem:[#allocation2] sm:$0xff]  ;;  %v977_v49 = vcvt.s32.f32 %v2442_v6  ;;  %v2154_v50 = vmov 9   ;;  %v2155_v51 = vmov 0   ;;  %v902_v3 = vld [vmem:[#allocation3] sm:$0xff]  ;;  %v2156_v52 = vmov 0.0   ;;  %p1557_p8 = scmp.ne.s32.totalorder %s2092_s27, 2 }
 0x3e3   : > { %1803 = vset.pattern.permute.xlu0 %v2154_v50  ;;  %1804 = vset.pattern.permute.xlu1 %v2155_v51  ;;  %vm2157_vm1 = vmmov 0   ;;  %v927_v53 = vrot.slane %v2480_v12, 4  ;;  %v2158_v44 = vmov 1.0  }
 0x3e4   : > { %905 = vperm.xlu0 %1803, %v901_v48   ;;  %980 = vperm.xlu1 %1804, %v977_v49  }
 0x3e5   : > { %1578 = vmatprep.subr.mxu0 %v2156_v52  ;;  %1580 = vmatprep.mubr.msk.f32.mxu0 %vm2157_vm1, %v2156_v52  ;;  %v928_v54 = vmax.f32 %v2480_v12, %v927_v53 }
 0x3e7   : > { %v929_v6 = vrot.slane %v928_v54, 2 }
 0x3e8   : > { %911 = vperm.xlu0 %1803, %v902_v3  }
 0x3e9   : > { %v930_v55 = vmax.f32 %v928_v54, %v929_v6  ;;  %v1075_v6 = vld [vmem:[#allocation5] sm:$0xff] }
 0x3eb   : > { %v931_v56 = vrot.slane %v930_v55, 1 }
 0x3ec   : > { %1805 = vset.pattern.permute.xlu0 %v2155_v51 }
 0x3ed   : > { %v932_v57 = vmax.f32 %v930_v55, %v931_v56 }
 0x3ef   : > { %vm933_vm2 = vcmp.eq.f32.partialorder %v2480_v12, %v932_v57 }
 0x3f0   : > { %v934_v58 = vsel %vm933_vm2, %v2461_v27, 8  ;;  %vm993_vm2 = vcmask 64512  }
 0x3f1   : > { %v935_v59 = vrot.slane %v934_v58, 4 }
 0x3f3   : > { %vm936_vm3 = vcmp.lt.s32.totalorder %v934_v58, %v935_v59 }
 0x3f4   : > { %v937_v60 = vsel %vm936_vm3, %v934_v58, %v935_v59 }
 0x3f5   : > { %v938_v61 = vrot.slane %v937_v60, 2 }
 0x3f7   : > { %vm939_vm4 = vcmp.lt.s32.totalorder %v937_v60, %v938_v61 }
 0x3f8   : > { %v940_v63 = vsel %vm939_vm4, %v937_v60, %v938_v61  ;;  %vm1073_vm4 = vcmask 7168  }
 0x3f9   : > { %v941_v1 = vrot.slane %v940_v63, 1 }
 0x3fb   : > { %vm942_vm12 = vcmp.lt.s32.totalorder %v940_v63, %v941_v1 }
 0x3fc   : > { %v943_v9 = vsel %vm942_vm12, %v940_v63, %v941_v1 }
 0x3fd   : > { %vm944_vm13 = vcmp.eq.s32.totalorder %v2461_v27, %v943_v9 }
 0x463   : > { %v906_v62 = vpop.permute.xlu0 %905  ;;  %v981_v41 = vpop.permute.xlu1 %980 }
 0x464   : > { %vm909_vm5 = vcmp.eq.f32.partialorder %v2487_v17, %v906_v62  ;;  %vm908_vm8 = vcmp.gt.f32.partialorder %v2487_v17, %v906_v62 }
 0x467   : > { %v912_v0 = vpop.permute.xlu0 %911 }
 0x468   : > { %vm913_vm7 = vcmp.le.s32.totalorder %v2425_v5, %v912_v0  ;;  %v1553_v5 = vsel %vm944_vm13, 1.0, %v2156_v52 }
 0x469   : > { %vm914_vm9 = vmand %vm909_vm5, %vm913_vm7 }
 0x46a   : > { %vm915_vm10 = vmor %vm908_vm8, %vm914_vm9 }
 0x46b   : > { %vm916_vm11 = vmand %vm915_vm10, %vm2474_vm6 }
 0x46c   : > { %v1552_v2 = vsel %vm916_vm11, 1.0, %v2156_v52 }
 0x46d   : > { %v919_v4 = vrot.slane %v1552_v2, 4 }
 0x46f   : > { %v920_v8 = vadd.f32 %v1552_v2, %v919_v4 }
 0x471   : > { %v921_v10 = vrot.slane %v920_v8, 2 }
 0x473   : > { %v922_v13 = vadd.f32 %v921_v10, %v920_v8 }
 0x475   : > { %v923_v14 = vrot.slane %v922_v13, 1 }
 0x477   : > { %v924_v15 = vadd.f32 %v923_v14, %v922_v13 }
 0x479   : > { %vm947_vm14 = vcmp.gt.f32.partialorder %v924_v15, 1.0 }
 0x47a   : > { %v950_v16 = vsel %vm947_vm14, %v1553_v5, %v1552_v2 }
 0x47b   : > { %v951_v18 = vrot.slane %v950_v16, 4  ;;  %v1068_v11 = vmul.f32 %v950_v16, %v2480_v12  ;;  %v1067_v19 = vmul.f32 %v950_v16, %v2487_v17 }
 0x47d   : > { %v952_v20 = vadd.f32 %v951_v18, %v950_v16  ;;  %v958_v21 = vmax.f32 %v950_v16, %v951_v18  ;;  %1076 = vmax.xlane.f32.xlu0 %v1068_v11  ;;  %1070 = vmax.xlane.f32.xlu1 %v1067_v19  ;;  %v1083_v22 = vrot.slane %v1067_v19, 4 }
 0x47f   : > { %v953_v23 = vrot.slane %v952_v20, 2  ;;  %v1084_v24 = vadd.f32 %v1083_v22, %v1067_v19  ;;  %v959_v25 = vrot.slane %v958_v21, 2 }
 0x481   : > { %v954_v26 = vadd.f32 %v953_v23, %v952_v20  ;;  %v1085_v28 = vrot.slane %v1084_v24, 2  ;;  %v960_v29 = vmax.f32 %v958_v21, %v959_v25 }
 0x483   : > { %v955_v30 = vrot.slane %v954_v26, 1  ;;  %v1086_v31 = vadd.f32 %v1085_v28, %v1084_v24  ;;  %v961_v32 = vrot.slane %v960_v29, 1 }
 0x485   : > { %v956_v33 = vadd.f32 %v955_v30, %v954_v26  ;;  %v1087_v12 = vrot.slane %v1086_v31, 1  ;;  %v962_v34 = vmax.f32 %v960_v29, %v961_v32 }
 0x487   : > { %1082 = vst [vmem:[%s2806_s1] sm:$0x1] %v956_v33  ;;  %v1088_v17 = vadd.f32 %v1087_v12, %v1086_v31  ;;  %vm963_vm6 = vcmp.eq.f32.partialorder %v950_v16, %v962_v34 }
 0x488   : > { %v964_v35 = vsel %vm963_vm6, %v2461_v27, 8 }
 0x489   : > { %1089 = vst [vmem:[%s2808_s10] sm:$0x1] %v1088_v17  ;;  %v965_v36 = vrot.slane %v964_v35, 4 }
 0x48b   : > { %vm966_vm15 = vcmp.lt.s32.totalorder %v964_v35, %v965_v36 }
 0x48c   : > { %v967_v37 = vsel %vm966_vm15, %v964_v35, %v965_v36 }
 0x48d   : > { %v968_v38 = vrot.slane %v967_v37, 2 }
 0x48f   : > { %vm969_vm0 = vcmp.lt.s32.totalorder %v967_v37, %v968_v38 }
 0x490   : > { %v970_v39 = vsel %vm969_vm0, %v967_v37, %v968_v38 }
 0x491   : > { %v971_v40 = vrot.slane %v970_v39, 1 }
 0x493   : > { %vm972_vm1 = vcmp.lt.s32.totalorder %v970_v39, %v971_v40 }
 0x494   : > { %v973_v42 = vsel %vm972_vm1, %v970_v39, %v971_v40 }
 0x495   : > { %vm974_vm3 = vcmp.eq.s32.totalorder %v2461_v27, %v973_v42  ;;  %1090 = vst [vmem:[%s2805_s9] sm:$0x1] %v973_v42 }
 0x496   : > { %v1554_v43 = vsel %vm974_vm3, 1.0, %v2156_v52  ;;  %1579 = vmatpush3.msk.msra.mxu0 %vm974_vm3, %v2158_v44  ;;  %v1069_v52 = vld [vmem:[#allocation4] sm:$0xff] }
 0x497   : > { %v983_v45 = vmul.f32 %v1554_v43, %v981_v41  ;;  %1581 = vmatmul.mubr.msk.f32.vlgmr.msra.gmra.mrb[0].mxu0 %vm993_vm2, %v2444_v7 }
 0x499   : > { %v984_v46 = vrot.slane %v983_v45, 4 }
 0x49b   : > { %v985_v47 = vadd.f32 %v984_v46, %v983_v45 }
 0x49d   : > { %v986_v48 = vrot.slane %v985_v47, 2 }
 0x49f   : > { %v987_v49 = vadd.f32 %v986_v48, %v985_v47 }
 0x4a1   : > { %v988_v50 = vrot.slane %v987_v49, 1 }
 0x4a3   : > { %v989_v51 = vadd.f32 %v988_v50, %v987_v49 }
 0x4a5   : > { %v990_v3 = vmax.f32 %v989_v51, 0.0 }
 0x4a7   : > { %v991_v53 = vmin.f32 %v990_v3, 16.0 }
 0x4a9   : > { %v1588_v27 = vtrunc.f32 %v991_v53 }
 0x4ab   : > { %v1589_v54 = vcvt.f32.s32 %v1588_v27 }
 0x4ad   : > { %1080 = vst [vmem:[%s2807_s28] sm:$0x1] %v1589_v54 }
 0x50a   : > { %v1077_v55 = vpop.xlane.xlu0 %1076  ;;  %v1071_v56 = vpop.xlane.xlu1 %1070 }
 0x50b   : > { %v1078_v57 = vmax.f32 %v1075_v6, %v1077_v55  ;;  %v1072_v7 = vmax.f32 %v1069_v52, %v1071_v56 }
 0x50d   : > { %1079 = vst.msk [vmem:[#allocation5] sm:$0xff] %vm1073_vm4, %v1078_v57  ;;  %1074 = vst.msk [vmem:[#allocation4] sm:$0xff] %vm1073_vm4, %v1072_v7 }
 0x514   : > { %v1096_v60 = vld [vmem:[#allocation4] sm:$0xff] (!%p1557_p8)  ;;  %v1095_v62 = vld [vmem:[#allocation5] sm:$0xff] (!%p1557_p8) }
 0x515   : > { %v1097_v61 = vadd.f32 (!%p1557_p8), 1e-08, %v1096_v60 }
 0x517   : > { %1806 = vrcp.f32 (!%p1557_p8), %v1097_v61 }
 0x521   : > { %v1807_v63 = vpop.eup (!%p1557_p8), %1806 }
 0x522   : > { %v1099_v0 = vmul.f32 (!%p1557_p8), %v1807_v63, %v1095_v62 }
 0x524   : > { %1100 = vst.msk [vmem:[%s635_s11] sm:$0xff] (!%p1557_p8), %vm1073_vm4, %v1099_v0 }
 0x565   : > { %1094 = sbr.rel (%p1557_p8) target bundleno = 1388 (0x56c), region = 79 }
 0x56a   : > { %v1063_v58 = vpop.f32.mrb[0].mxu0 }
 0x56b   : > { %1081 = vst [vmem:[%s2492_s6] sm:$0xf] %v1063_v58  ;;  %v1582_v59 = vpop.f32.mrb[1].mxu0 }
 0x56c PF: > { %s2851_s30 = sld [smem:[#allocation21_spill]]  ;;  %s1590_s8 = smul.u32 3, %s2100_s29 }
 0x56d   : > { %s1154_s18 = sshll.u32 %s2492_s6, 4  ;;  %s2852_s26 = sld [smem:[#allocation36_spill]]  ;;  %s2570_s18 = int_to_ptr.vmem [resolvable:$true] %s1154_s18 }
 0x56e   : > { %s2856_s6 = sand.u32 1, %s2293_s16   ;;  %p2857_p11 = scmp.ne.s32.totalorder %s2832_s19, 0 }
 0x572   : > { %s1129_s2 = smul.u32 %s2092_s27, %s2851_s30  ;;  %s2854_s27 = sld [smem:[#allocation38_spill]] }
 0x573   : > { %s2853_s9 = smov %s2852_s26  ;;  %s2587_s30 = scalar_lea.sflag [#allocation11], %s2856_s6 }
 0x574   : > { %s1134_s7 = sadd.s32 %s1590_s8, %s1129_s2  ;;  %s1838_s2 = scalar_lea.vmem %s2570_s18, 64 }
 0x575   : > { %s2572_s11 = sshll.u32 %s1134_s7, 4  ;;  %s1560_s17 = sshll.u32 %s1134_s7, 6 }
 0x576   : > { %s2577_s1 = scalar_lea.hbm %s2852_s26, %s1560_s17  ;;  %p1839_p10 = scmp.ne.s32.totalorder %s2570_s18, %s1838_s2 }
 0x577   : > { %s2159_s8 = smov [#allocation10]  }
 0x578   : > { %s2855_s14 = smov %s2854_s27  ;;  %s2583_s29 = scalar_lea.hbm %s2854_s27, %s2572_s11 }
 0x579   : > { %p1840_p12 = pnand %p1839_p10, %p2857_p11  ;;  %s1842_s7 = sshll.u32 %s2159_s8, 4  ;;  %s1843_s7 = int_to_ptr.vmem [resolvable:$false] %s1842_s7 }
 0x57a   : > { %s1844_s3 = scalar_lea.vmem %s1843_s7, 128  ;;  %p1845_p9 = scmp.lt.s32.totalorder %s2570_s18, %s1843_s7 }
 0x57b   : > { %p1841_p6 = pneg %p1840_p12  ;;  %p1846_p13 = scmp.lt.s32.totalorder %s1844_s3, %s1838_s2 }
 0x57d   : > { %p1847_p0 = por %p1846_p13, %p1845_p9 }
 0x57f   : > { %p1848_p7 = pnand %p1847_p0, %p1841_p6 }
 0x581   : > { %1851 = shalt.err (!%p1848_p7)
}
 0x582   : > { %s1852_s28 = scalar_lea.hbm %s2577_s1, 64  ;;  %s1856_s0 = scalar_lea.hbm %s2853_s9, 384 }
 0x583   : > { %p1853_p2 = scmp.ne.s32.totalorder %s2577_s1, %s1852_s28  ;;  %p1857_p3 = scmp.lt.u32.totalorder %s2577_s1, %s2853_s9 }
 0x584   : > { %p1858_p5 = scmp.lt.u32.totalorder %s1856_s0, %s1852_s28  ;;  %p1860_p10 = scmp.lt.u32.totalorder %s1852_s28, %s2577_s1 }
 0x585   : > { %p1854_p4 = pnand %p1853_p2, %p2857_p11 }
 0x586   : > { %p1859_p8 = por %p1858_p5, %p1857_p3 }
 0x587   : > { %p1855_p1 = pneg %p1854_p4 }
 0x588   : > { %p1861_p12 = por %p1860_p10, %p1859_p8 }
 0x58a   : > { %p1862_p6 = pnand %p1861_p12, %p1855_p1 }
 0x58c   : > { %1865 = shalt.err (!%p1862_p6)
}
 0x58d   : > { %1598 = dma.vmem_to_hbm [thread:$0]  (%p2857_p11), %s2570_s18, 64, %s2577_s1, %s2587_s30  }
 0x58e   : > { %s2858_s3 = scalar_lea.vmem [#allocation13], %s2410_s20  ;;  %s2859_s8 = sld [smem:[#allocation35_spill]] }
 0x58f   : > { %s1186_s27 = sshll.u32 %s2858_s3, 4  ;;  %s2860_s28 = sand.u32 1, %s2293_s16   ;;  %s2613_s27 = int_to_ptr.vmem [resolvable:$true] %s1186_s27 }
 0x590   : > { %s2623_s10 = scalar_lea.sflag [#allocation14], %s2860_s28  ;;  %s1866_s17 = scalar_lea.vmem %s2613_s27, 16 }
 0x591   : > { %p1867_p9 = scmp.ne.s32.totalorder %s2613_s27, %s1866_s17  ;;  %s2160_s1 = smov [#allocation13]  }
 0x592   : > { %s1870_s18 = sshll.u32 %s2160_s1, 4  ;;  %s1871_s18 = int_to_ptr.vmem [resolvable:$false] %s1870_s18 }
 0x593   : > { %p1868_p13 = pnand %p1867_p9, %p2857_p11  ;;  %s1872_s0 = scalar_lea.vmem %s1871_s18, 32 }
 0x594   : > { %s2619_s7 = scalar_lea.hbm %s2859_s8, %s2572_s11  ;;  %p1873_p7 = scmp.lt.s32.totalorder %s2613_s27, %s1871_s18 }
 0x595   : > { %p1869_p0 = pneg %p1868_p13  ;;  %p1874_p2 = scmp.lt.s32.totalorder %s1872_s0, %s1866_s17 }
 0x597   : > { %p1875_p4 = por %p1874_p2, %p1873_p7 }
 0x599   : > { %p1876_p1 = pnand %p1875_p4, %p1869_p0 }
 0x59b   : > { %1879 = shalt.err (!%p1876_p1)
}
 0x59c   : > { %s1880_s16 = scalar_lea.hbm %s2583_s29, 16  ;;  %s1884_s3 = scalar_lea.hbm %s2855_s14, 96 }
 0x59d   : > { %p1881_p3 = scmp.ne.s32.totalorder %s2583_s29, %s1880_s16  ;;  %p1885_p10 = scmp.lt.u32.totalorder %s2583_s29, %s2855_s14 }
 0x59e   : > { %p1886_p12 = scmp.lt.u32.totalorder %s1884_s3, %s1880_s16  ;;  %p1888_p9 = scmp.lt.u32.totalorder %s1880_s16, %s2583_s29 }
 0x59f   : > { %p1882_p5 = pnand %p1881_p3, %p2857_p11 }
 0x5a0   : > { %p1887_p6 = por %p1886_p12, %p1885_p10 }
 0x5a1   : > { %p1883_p8 = pneg %p1882_p5 }
 0x5a2   : > { %p1889_p13 = por %p1888_p9, %p1887_p6 }
 0x5a4   : > { %p1890_p0 = pnand %p1889_p13, %p1883_p8 }
 0x5a6   : > { %1893 = shalt.err (!%p1890_p0)
}
 0x5a7   : > { %1600 = dma.vmem_to_hbm [thread:$0]  (%p2857_p11), %s2613_s27, 16, %s2583_s29, %s2623_s10  }
 0x5a8   : > { %s2861_s28 = scalar_lea.vmem [#allocation9], %s2410_s20  ;;  %s2862_s0 = sld [smem:[#allocation37_spill]] }
 0x5a9   : > { %s1138_s17 = sshll.u32 %s2861_s28, 4  ;;  %s2863_s13 = scalar_lea.vmem [#allocation12], %s2410_s20  ;;  %s2655_s17 = int_to_ptr.vmem [resolvable:$true] %s1138_s17 }
 0x5aa   : > { %s2659_s26 = sshll.u32 %s2863_s13, 4  ;;  %s1102_s3 = scalar_lea.sflag [#allocation8], %s2410_s20  ;;  %s1171_s26 = int_to_ptr.vmem [resolvable:$true] %s2659_s26 }
 0x5ab   : > { %s1894_s6 = scalar_lea.vmem %s2655_s17, 16  ;;  %s2161_s29 = smov [#allocation9]  }
 0x5ac   : > { %p1895_p7 = scmp.ne.s32.totalorder %s2655_s17, %s1894_s6  ;;  %s1898_s27 = sshll.u32 %s2161_s29, 4  ;;  %s1899_s27 = int_to_ptr.vmem [resolvable:$false] %s1898_s27 }
 0x5ad   : > { %s1900_s2 = scalar_lea.vmem %s1899_s27, 32  ;;  %p1901_p1 = scmp.lt.s32.totalorder %s2655_s17, %s1899_s27 }
 0x5ae   : > { %s2653_s16 = scalar_lea.hbm %s2862_s0, %s2572_s11  ;;  %p1896_p2 = pnand %p1895_p7, %p2857_p11 }
 0x5af   : > { %p1902_p3 = scmp.lt.s32.totalorder %s1900_s2, %s1894_s6 }
 0x5b0   : > { %p1897_p4 = pneg %p1896_p2 }
 0x5b1   : > { %p1903_p5 = por %p1902_p3, %p1901_p1 }
 0x5b3   : > { %p1904_p8 = pnand %p1903_p5, %p1897_p4 }
 0x5b5   : > { %1907 = shalt.err (!%p1904_p8)
}
 0x5b6   : > { %s1908_s28 = scalar_lea.hbm %s2619_s7, 16  ;;  %s1912_s13 = scalar_lea.hbm %s2859_s8, 96 }
 0x5b7   : > { %p1909_p10 = scmp.ne.s32.totalorder %s2619_s7, %s1908_s28  ;;  %p1913_p9 = scmp.lt.u32.totalorder %s2619_s7, %s2859_s8 }
 0x5b8   : > { %p1914_p13 = scmp.lt.u32.totalorder %s1912_s13, %s1908_s28  ;;  %p1916_p7 = scmp.lt.u32.totalorder %s1908_s28, %s2619_s7 }
 0x5b9   : > { %p1910_p12 = pnand %p1909_p10, %p2857_p11 }
 0x5ba   : > { %p1915_p0 = por %p1914_p13, %p1913_p9 }
 0x5bb   : > { %p1911_p6 = pneg %p1910_p12 }
 0x5bc   : > { %p1917_p2 = por %p1916_p7, %p1915_p0 }
 0x5be   : > { %p1918_p4 = pnand %p1917_p2, %p1911_p6 }
 0x5c0   : > { %1921 = shalt.err (!%p1918_p4)
}
 0x5c1   : > { %1597 = dma.vmem_to_hbm [thread:$0]  (%p2857_p11), %s2655_s17, 16, %s2619_s7, %s1102_s3  }
 0x5c2   : > { %s2864_s1 = sld [smem:[#allocation39_spill]]  ;;  %s1922_s13 = scalar_lea.vmem %s1171_s26, 16 }
 0x5c3   : > { %p1923_p1 = scmp.ne.s32.totalorder %s1171_s26, %s1922_s13  ;;  %s2162_s28 = smov [#allocation12]  }
 0x5c4   : > { %s1926_s29 = sshll.u32 %s2162_s28, 4  ;;  %s1927_s29 = int_to_ptr.vmem [resolvable:$false] %s1926_s29 }
 0x5c5   : > { %p1924_p3 = pnand %p1923_p1, %p2857_p11  ;;  %s1928_s27 = scalar_lea.vmem %s1927_s29, 32 }
 0x5c6   : > { %p1929_p8 = scmp.lt.s32.totalorder %s1171_s26, %s1927_s29  ;;  %p1930_p10 = scmp.lt.s32.totalorder %s1928_s27, %s1922_s13 }
 0x5c7   : > { %p1925_p5 = pneg %p1924_p3 }
 0x5c8   : > { %s2688_s18 = scalar_lea.hbm %s2864_s1, %s2572_s11  ;;  %p1931_p12 = por %p1930_p10, %p1929_p8 }
 0x5ca   : > { %p1932_p6 = pnand %p1931_p12, %p1925_p5 }
 0x5cc   : > { %1935 = shalt.err (!%p1932_p6)
}
 0x5cd   : > { %s1936_s11 = scalar_lea.hbm %s2653_s16, 16  ;;  %s1940_s3 = scalar_lea.hbm %s2862_s0, 96 }
 0x5ce   : > { %p1937_p9 = scmp.ne.s32.totalorder %s2653_s16, %s1936_s11  ;;  %p1941_p7 = scmp.lt.u32.totalorder %s2653_s16, %s2862_s0 }
 0x5cf   : > { %p1942_p2 = scmp.lt.u32.totalorder %s1940_s3, %s1936_s11  ;;  %p1944_p1 = scmp.lt.u32.totalorder %s1936_s11, %s2653_s16 }
 0x5d0   : > { %p1938_p13 = pnand %p1937_p9, %p2857_p11 }
 0x5d1   : > { %p1943_p4 = por %p1942_p2, %p1941_p7 }
 0x5d2   : > { %p1939_p0 = pneg %p1938_p13 }
 0x5d3   : > { %p1945_p3 = por %p1944_p1, %p1943_p4 }
 0x5d5   : > { %p1946_p5 = pnand %p1945_p3, %p1939_p0 }
 0x5d7   : > { %1949 = shalt.err (!%p1946_p5)
}
 0x5d8   : > { %1599 = dma.vmem_to_hbm [thread:$0]  (%p2857_p11), %s1171_s26, 16, %s2653_s16, %s2587_s30  }
 0x5d9   : > { %s2865_s13 = scalar_lea.vmem [#allocation15], %s2410_s20  ;;  %s2163_s27 = smov [#allocation15]  }
 0x5da   : > { %s1202_s28 = sshll.u32 %s2865_s13, 4  ;;  %s1954_s11 = sshll.u32 %s2163_s27, 4  ;;  %s1203_s28 = int_to_ptr.vmem [resolvable:$true] %s1202_s28  ;;  %s1955_s11 = int_to_ptr.vmem [resolvable:$false] %s1954_s11 }
 0x5db   : > { %s1950_s29 = scalar_lea.vmem %s1203_s28, 16  ;;  %s1956_s7 = scalar_lea.vmem %s1955_s11, 32 }
 0x5dc   : > { %p1951_p8 = scmp.ne.s32.totalorder %s1203_s28, %s1950_s29  ;;  %p1957_p6 = scmp.lt.s32.totalorder %s1203_s28, %s1955_s11 }
 0x5dd   : > { %p1958_p9 = scmp.lt.s32.totalorder %s1956_s7, %s1950_s29 }
 0x5de   : > { %p1952_p10 = pnand %p1951_p8, %p2857_p11 }
 0x5df   : > { %p1959_p13 = por %p1958_p9, %p1957_p6 }
 0x5e0   : > { %p1953_p12 = pneg %p1952_p10 }
 0x5e2   : > { %p1960_p0 = pnand %p1959_p13, %p1953_p12 }
 0x5e4   : > { %1963 = shalt.err (!%p1960_p0)
}
 0x5e5   : > { %s1964_s20 = scalar_lea.hbm %s2688_s18, 16  ;;  %s1968_s26 = scalar_lea.hbm %s2864_s1, 96 }
 0x5e6   : > { %p1965_p7 = scmp.ne.s32.totalorder %s2688_s18, %s1964_s20  ;;  %p1969_p1 = scmp.lt.u32.totalorder %s2688_s18, %s2864_s1 }
 0x5e7   : > { %p1970_p3 = scmp.lt.u32.totalorder %s1968_s26, %s1964_s20  ;;  %p1972_p8 = scmp.lt.u32.totalorder %s1964_s20, %s2688_s18 }
 0x5e8   : > { %p1966_p2 = pnand %p1965_p7, %p2857_p11 }
 0x5e9   : > { %p1971_p5 = por %p1970_p3, %p1969_p1 }
 0x5ea   : > { %p1967_p4 = pneg %p1966_p2 }
 0x5eb   : > { %p1973_p10 = por %p1972_p8, %p1971_p5 }
 0x5ed   : > { %p1974_p12 = pnand %p1973_p10, %p1967_p4 }
 0x5ef   : > { %1977 = shalt.err (!%p1974_p12)
}
 0x5f0   : > { %1601 = dma.vmem_to_hbm [thread:$0]  (%p2857_p11), %s1203_s28, 16, %s2688_s18, %s2623_s10  }
 0x5f1 PF: > { %p1628_p6 = scmp.ge.s32.totalorder %s2116_s15, 2  ;;  %s1217_s6 = sand.u32 1, %s2068_s21  }
 0x5f2   : > { %p2866_p9 = scmp.ne.s32.totalorder %s2837_s24, 0  ;;  %s1218_s2 = scalar_lea.sflag [#allocation8], %s1217_s6 }
 0x5f4   : > { %p1612_p13 = pnand %p1628_p6, %p2866_p9 }
 0x5f6   : > { %2055 = dma.done.wait (!%p1612_p13), %s1218_s2, 16  }
 0x5f7   : > { %2057 = vsyncadd (!%p1612_p13), %s1218_s2, 4294967280  ;;  %s2867_s13 = sadd.s32 4294967294, %s2116_s15  }
 0x5f8   : > { %s1225_s29 = sand.u32 1, %s2867_s13  }
 0x5f9   : > { %s1226_s27 = scalar_lea.sflag [#allocation11], %s1225_s29 }
 0x5fa   : > { %2059 = dma.done.wait (!%p1612_p13), %s1226_s27, 80  }
 0x5fb   : > { %2061 = vsyncadd (!%p1612_p13), %s1226_s27, 4294967216  ;;  %s1243_s19 = scalar_lea.sflag [#allocation14], %s1225_s29 }
 0x5fc   : > { %2063 = dma.done.wait (!%p1612_p13), %s1243_s19, 32  }
 0x5fd   : > { %2065 = vsyncadd (!%p1612_p13), %s1243_s19, 4294967264  ;;  %s35_s15 = sadd.s32 1, %s2116_s15   ;;  %s2869_s24 = sld [smem:[#allocation29_spill]] }
 0x5fe   : > { %p2735_p11 = scmp.ge.s32.totalorder %s35_s15, 14   ;;  %s2870_s18 = sld [smem:[#allocation20_spill]] }
 0x5ff   : > { %s2871_s26 = sld [smem:[#allocation28_spill]]  ;;  %s2872_s27 = sld [smem:[#allocation22_spill]] }
 0x600   : > { %s2873_s28 = sld [smem:[#allocation23_spill]]  ;;  %s2874_s29 = sld [smem:[#allocation24_spill]] }
 0x601   : > { %s2875_s30 = sld [smem:[#allocation25_spill]]  ;;  %s2876_s13 = sld [smem:[#allocation26_spill]] }
 0x602   : > { %s2877_s11 = sld [smem:[#allocation27_spill]]  ;;  %s2878_s21 = smov %s2072_s22 }
 0x603   : > { %s2879_s22 = smov %s2076_s23  ;;  %s2880_s23 = smov %s2869_s24 }
 0x604   : > { %s2881_s24 = smov %s2084_s25  ;;  %s2882_s25 = smov %s2870_s18 }
 0x605   :  { %34 = sbr.rel (!%p2735_p11) target bundleno = 25 (0x19), region = 225 }
 0x608   : > { %2883 = sst [smem:[#allocation20_spill]] %s2877_s11 }
 0x60c   :  { %1262 = vsyncpa [#allocation7], 1 }
 0x60d   :  { %1264 = vsyncpa [#allocation7 + $0x1], 1 }
 0x60e   :  { %1265 = vsyncpa [#allocation8], 1 }
 0x60f   :  { %1267 = vsyncpa [#allocation8 + $0x1], 1 }
 0x610   :  { %1268 = vsyncpa [#allocation11], 1 }
 0x611   :  { %1270 = vsyncpa [#allocation11 + $0x1], 1 }
 0x612   :  { %1271 = vsyncpa [#allocation14], 1 }
 0x613   :  { %1273 = vsyncpa [#allocation14 + $0x1], 1 }

</bundles_post_ra>
